<compile_context>
chip_gen: v6e
topology: v6e:2x2x1
jax: 0.10.0
libtpu: 0.0.40
codegen_flags: <defaults>
</compile_context>

<pallas_src>
import functools

import jax
import jax.numpy as jnp
import numpy as np
from jax.experimental import pallas as pl
from jax.experimental.pallas import tpu as pltpu

# ---------------- Model_S hyper-parameters (small, consistent with the module) ----------------
EMBED_SIZE = 16      # Embeddings h_size (token embedding width)
H_SIZE     = 32      # h_attn_size / transformer hidden size
INTER_SIZE = 64
VOCAB_SIZE = 32
MAX_LEN    = 16
N_HEADS    = 4
HEAD_DIM   = H_SIZE // N_HEADS
N_LAYERS   = 2
PER_LAYER  = 1
TAU1       = 1.0
LN_EPS     = 1e-5

# TODO(synk): dual=True (DualStoSelfAttention centroid quantization of K) not implemented; model built with dual=False.
# TODO(synk): use_elmo=1 (ELMo embeddings) has no Pallas equivalent (external network weights); built with use_elmo=0.


def _erf_f32(z):
    # Abramowitz & Stegun 7.1.26 rational erf, |abs err| < 1.5e-7 (~f32 ulp): numerically
    # equivalent to exact erf-GELU while using only exp / div / select (safe Mosaic lowering).
    a1 = np.float32(0.254829592); a2 = np.float32(-0.284496736); a3 = np.float32(1.421413741)
    a4 = np.float32(-1.453152027); a5 = np.float32(1.061405429); p = np.float32(0.3275911)
    sgn = jnp.where(z >= 0, np.float32(1.0), np.float32(-1.0))
    az = jnp.abs(z)
    t = np.float32(1.0) / (np.float32(1.0) + p * az)
    poly = ((((a5 * t + a4) * t + a3) * t + a2) * t + a1) * t
    return sgn * (np.float32(1.0) - poly * jnp.exp(-az * az))


# ---------------------------------- fused forward kernel ----------------------------------
def _fused_forward_kernel(rep_ref, pe_ref, mask_col_ref, mask_row_ref, bid_col_ref, bid_row_ref,
                          gum_ref,
                          emb_ln_g_ref, emb_ln_b_ref, emb_w_ref, emb_b_ref,
                          wqkv_ref, bqkv_ref, wo_ref, bo_ref,
                          ln1_g_ref, ln1_b_ref, wi_ref, bi_ref,
                          wf_ref, bf_ref, ln2_g_ref, ln2_b_ref,
                          pool_w_ref, pool_b_ref,
                          logits_ref, *, B, S):
    BS = B * S
    D = HEAD_DIM
    inv_tau = np.float32(1.0 / TAU1)
    NEG = np.float32(-1e30)

    def layer_norm(v, g, b):
        mu = jnp.mean(v, axis=-1, keepdims=True)
        var = jnp.mean((v - mu) ** 2, axis=-1, keepdims=True)
        return (v - mu) * jax.lax.rsqrt(var + np.float32(LN_EPS)) * g + b

    # --- masks, built once and reused by both layers ---
    # mask_1 * mask_2 of the module == outer product of the flattened input_mask (one VPU multiply).
    padm = mask_col_ref[...] * mask_row_ref[...]                                   # (BS, BS)
    # Block-diagonal additive bias: -inf for cross-batch key columns so the per-batch softmax
    # denominator is exactly the S same-batch keys (the module softmaxes over S keys pre-masking).
    block_bias = jnp.where(bid_col_ref[...] == bid_row_ref[...],
                           np.float32(0.0), NEG)                                   # (BS, BS)

    # --- Embeddings: LN(token_emb + pos_emb) -> project to H_SIZE ---
    x = layer_norm(rep_ref[...] + pe_ref[...], emb_ln_g_ref[...], emb_ln_b_ref[...])
    x = jnp.dot(x, emb_w_ref[...], preferred_element_type=jnp.float32) + emb_b_ref[...]   # (BS, H)

    # --- Transformer layers (weights stay resident in VMEM; loop is Python-unrolled) ---
    for step in range(N_LAYERS * PER_LAYER):
        li = step // PER_LAYER

        # fused QKV projection: one (BS, 3H) matmul instead of three (BS, H) ones
        qkv = jnp.dot(x, wqkv_ref[li], preferred_element_type=jnp.float32) + bqkv_ref[li]  # (BS, 3H)

        # head-batched views: (NH, BS, D) -- 4 lane slices + a leading-dim stack per tensor
        q = jnp.stack([qkv[:, h * D:(h + 1) * D] for h in range(N_HEADS)], axis=0)
        k = jnp.stack([qkv[:, H_SIZE + h * D:H_SIZE + (h + 1) * D]
                       for h in range(N_HEADS)], axis=0)
        v = jnp.stack([qkv[:, 2 * H_SIZE + h * D:2 * H_SIZE + (h + 1) * D]
                       for h in range(N_HEADS)], axis=0)

        # one batched q @ k^T over all heads (no 1/sqrt(d) scaling, as in the module)
        scores = jnp.einsum('hqd,hkd->hqk', q, k,
                            preferred_element_type=jnp.float32)                    # (NH, BS, BS)

        # gumbel_softmax(hard=False, tau=tau1): precomputed host-side Gumbel noise, one batched softmax
        logit = (scores + gum_ref[step]) * inv_tau + block_bias[None, :, :]
        logit = logit - jnp.max(logit, axis=-1, keepdims=True)
        e = jnp.exp(logit)
        attn = e / jnp.sum(e, axis=-1, keepdims=True)
        attn = attn * padm[None, :, :]                    # mask applied post-softmax (as in module)

        ctx_h = jnp.einsum('hqk,hkd->hqd', attn, v,
                           preferred_element_type=jnp.float32)                     # (NH, BS, D)
        ctx = jnp.concatenate([ctx_h[h] for h in range(N_HEADS)], axis=-1)         # (BS, H)

        out = jnp.dot(ctx, wo_ref[li], preferred_element_type=jnp.float32) + bo_ref[li]       # self.out
        attn_out = layer_norm(out + x, ln1_g_ref[li], ln1_b_ref[li])                          # LN(out + input)

        hid = jnp.dot(attn_out, wi_ref[li], preferred_element_type=jnp.float32) + bi_ref[li]  # Intermediate
        hid = 0.5 * hid * (1.0 + _erf_f32(hid * np.float32(1.0 / np.sqrt(2.0))))              # GELU (erf-exact to f32)
        ffn = jnp.dot(hid, wf_ref[li], preferred_element_type=jnp.float32) + bf_ref[li]       # FFN.linear
        x = layer_norm(ffn + attn_out, ln2_g_ref[li], ln2_b_ref[li])                          # LN(out + attn)

    # --- Pooler: position 0 of every sequence -> (B, 2) logits ---
    cls = jnp.reshape(x, (B, S, H_SIZE))[:, 0, :]                                  # (B, H)
    logits_ref[...] = (jnp.dot(cls, pool_w_ref[...], preferred_element_type=jnp.float32)
                       + pool_b_ref[...])


# ---------------------------------- model forward (single pallas_call) ----------------------------------
@jax.jit
def model_forward(params, token, pos, input_mask, rng_key):
    B, S = token.shape
    BS = B * S
    # embedding gathers + noise sampling stay as XLA ops; everything else is in the fused kernel
    rep = params["tok_emb"][token].reshape(BS, EMBED_SIZE)
    pe = params["pos_emb"][pos].reshape(BS, EMBED_SIZE)
    mask_col = input_mask.astype(jnp.float32).reshape(BS, 1)
    mask_row = input_mask.astype(jnp.float32).reshape(1, BS)
    bid = (jnp.arange(BS, dtype=jnp.int32) // S).astype(jnp.float32)
    bid_col = bid.reshape(BS, 1)
    bid_row = bid.reshape(1, BS)
    # host-side Gumbel(0,1) noise: one fresh draw per layer application, per head, per (q, k) pair
    gumbel = jax.random.gumbel(rng_key, (N_LAYERS * PER_LAYER, N_HEADS, BS, BS), jnp.float32)

    vmem = pl.BlockSpec(memory_space=pltpu.MemorySpace.VMEM)
    kern = functools.partial(_fused_forward_kernel, B=B, S=S)
    return pl.pallas_call(
        kern,
        out_shape=jax.ShapeDtypeStruct((B, 2), jnp.float32),
        in_specs=[vmem] * 25,
        out_specs=vmem,
    )(rep, pe, mask_col, mask_row, bid_col, bid_row, gumbel,
      params["emb_ln_g"], params["emb_ln_b"], params["emb_proj_w"], params["emb_proj_b"],
      params["wqkv"], params["bqkv"], params["wo"], params["bo"],
      params["ln1_g"], params["ln1_b"], params["wi"], params["bi"],
      params["wf"], params["bf"], params["ln2_g"], params["ln2_b"],
      params["pool_w"], params["pool_b"])


# ---------------------------------- deterministic parameter init ----------------------------------
def init_linear_params(key, din, dout):
    k1, k2 = jax.random.split(key)
    lim = 1.0 / np.sqrt(din)
    w = jax.random.uniform(k1, (din, dout), jnp.float32, -lim, lim)
    b = jax.random.uniform(k2, (1, dout), jnp.float32, -lim, lim)
    return w, b


def init_params(key):
    keys = iter(jax.random.split(key, 64))
    p = {}
    tok = 0.1 * jax.random.normal(next(keys), (VOCAB_SIZE, EMBED_SIZE), jnp.float32)
    p["tok_emb"] = tok.at[0].set(0.0)                              # padding_idx=0
    p["pos_emb"] = 0.1 * jax.random.normal(next(keys), (MAX_LEN, EMBED_SIZE), jnp.float32)
    p["emb_ln_g"] = jnp.ones((1, EMBED_SIZE), jnp.float32)
    p["emb_ln_b"] = jnp.zeros((1, EMBED_SIZE), jnp.float32)
    p["emb_proj_w"], p["emb_proj_b"] = init_linear_params(next(keys), EMBED_SIZE, H_SIZE)

    wqkv, bqkv, wo, bo, wi, bi, wf, bf = [], [], [], [], [], [], [], []
    for _ in range(N_LAYERS):
        wq, bq = init_linear_params(next(keys), H_SIZE, H_SIZE)
        wk, bk = init_linear_params(next(keys), H_SIZE, H_SIZE)
        wv, bv = init_linear_params(next(keys), H_SIZE, H_SIZE)
        wqkv.append(jnp.concatenate([wq, wk, wv], axis=1))         # (H, 3H) fused QKV weight
        bqkv.append(jnp.concatenate([bq, bk, bv], axis=1))         # (1, 3H)
        w, b = init_linear_params(next(keys), H_SIZE, H_SIZE);    wo.append(w); bo.append(b)
        w, b = init_linear_params(next(keys), H_SIZE, INTER_SIZE); wi.append(w); bi.append(b)
        w, b = init_linear_params(next(keys), INTER_SIZE, H_SIZE); wf.append(w); bf.append(b)
    p["wqkv"] = jnp.stack(wqkv); p["bqkv"] = jnp.stack(bqkv)
    p["wo"] = jnp.stack(wo);     p["bo"] = jnp.stack(bo)
    p["wi"] = jnp.stack(wi);     p["bi"] = jnp.stack(bi)
    p["wf"] = jnp.stack(wf);     p["bf"] = jnp.stack(bf)
    p["ln1_g"] = jnp.ones((N_LAYERS, 1, H_SIZE), jnp.float32)
    p["ln1_b"] = jnp.zeros((N_LAYERS, 1, H_SIZE), jnp.float32)
    p["ln2_g"] = jnp.ones((N_LAYERS, 1, H_SIZE), jnp.float32)
    p["ln2_b"] = jnp.zeros((N_LAYERS, 1, H_SIZE), jnp.float32)
    p["pool_w"], p["pool_b"] = init_linear_params(next(keys), H_SIZE, 2)
    return p


# ---------------------------------- main ----------------------------------
if __name__ == "__main__":
    root = jax.random.PRNGKey(0)
    pkey, tkey, gkey = jax.random.split(root, 3)
    params = init_params(pkey)

    B, S = 2, 8
    token = jax.random.randint(tkey, (B, S), 1, VOCAB_SIZE)        # no padding tokens in sequence bodies
    pos = jnp.broadcast_to(jnp.arange(S, dtype=jnp.int32), (B, S))
    input_mask = jnp.ones((B, S), jnp.float32).at[1, 6:].set(0.0)  # second sequence has 2 padded positions

    out = model_forward(params, token, pos, input_mask, gkey)
    out = jax.block_until_ready(out)
    assert out.shape == (B, 2), out.shape
    assert bool(jnp.all(jnp.isfinite(out)))
    print("KERNEL_OK")
</pallas_src>

<mosaic_0001>
module attributes {stable_mosaic.version = 11 : i64} {
  func.func @_fused_forward_kernel(%arg0: memref<16x16xf32, #tpu.memory_space<vmem>>, %arg1: memref<16x16xf32, #tpu.memory_space<vmem>>, %arg2: memref<16x1xf32, #tpu.memory_space<vmem>>, %arg3: memref<1x16xf32, #tpu.memory_space<vmem>>, %arg4: memref<16x1xf32, #tpu.memory_space<vmem>>, %arg5: memref<1x16xf32, #tpu.memory_space<vmem>>, %arg6: memref<2x4x16x16xf32, #tpu.memory_space<vmem>>, %arg7: memref<1x16xf32, #tpu.memory_space<vmem>>, %arg8: memref<1x16xf32, #tpu.memory_space<vmem>>, %arg9: memref<16x32xf32, #tpu.memory_space<vmem>>, %arg10: memref<1x32xf32, #tpu.memory_space<vmem>>, %arg11: memref<2x32x96xf32, #tpu.memory_space<vmem>>, %arg12: memref<2x1x96xf32, #tpu.memory_space<vmem>>, %arg13: memref<2x32x32xf32, #tpu.memory_space<vmem>>, %arg14: memref<2x1x32xf32, #tpu.memory_space<vmem>>, %arg15: memref<2x1x32xf32, #tpu.memory_space<vmem>>, %arg16: memref<2x1x32xf32, #tpu.memory_space<vmem>>, %arg17: memref<2x32x64xf32, #tpu.memory_space<vmem>>, %arg18: memref<2x1x64xf32, #tpu.memory_space<vmem>>, %arg19: memref<2x64x32xf32, #tpu.memory_space<vmem>>, %arg20: memref<2x1x32xf32, #tpu.memory_space<vmem>>, %arg21: memref<2x1x32xf32, #tpu.memory_space<vmem>>, %arg22: memref<2x1x32xf32, #tpu.memory_space<vmem>>, %arg23: memref<32x2xf32, #tpu.memory_space<vmem>>, %arg24: memref<1x2xf32, #tpu.memory_space<vmem>>, %arg25: memref<2x2xf32, #tpu.memory_space<vmem>>) attributes {dimension_semantics = [], scalar_prefetch = 0 : i64, scratch_operands = 0 : i64, tpu.core_type = #tpu.core_type<tc>} {
    %c0 = arith.constant 0 : index
    %c0_0 = arith.constant 0 : index
    %0 = vector.load %arg2[%c0, %c0_0] : memref<16x1xf32, #tpu.memory_space<vmem>>, vector<16x1xf32>
    %c0_1 = arith.constant 0 : index
    %c0_2 = arith.constant 0 : index
    %1 = vector.load %arg3[%c0_1, %c0_2] : memref<1x16xf32, #tpu.memory_space<vmem>>, vector<1x16xf32>
    %2 = vector.broadcast %0 : vector<16x1xf32> to vector<16x16xf32>
    %3 = vector.broadcast %1 : vector<1x16xf32> to vector<16x16xf32>
    %4 = arith.mulf %2, %3 : vector<16x16xf32>
    %c0_3 = arith.constant 0 : index
    %c0_4 = arith.constant 0 : index
    %5 = vector.load %arg4[%c0_3, %c0_4] : memref<16x1xf32, #tpu.memory_space<vmem>>, vector<16x1xf32>
    %c0_5 = arith.constant 0 : index
    %c0_6 = arith.constant 0 : index
    %6 = vector.load %arg5[%c0_5, %c0_6] : memref<1x16xf32, #tpu.memory_space<vmem>>, vector<1x16xf32>
    %7 = vector.broadcast %5 : vector<16x1xf32> to vector<16x16xf32>
    %8 = vector.broadcast %6 : vector<1x16xf32> to vector<16x16xf32>
    %9 = arith.cmpf oeq, %7, %8 : vector<16x16xf32>
    %cst = arith.constant 0.000000e+00 : f32
    %cst_7 = arith.constant -1.000000e+30 : f32
    %10 = vector.broadcast %cst : f32 to vector<16x16xf32>
    %11 = vector.broadcast %cst_7 : f32 to vector<16x16xf32>
    %12 = arith.select %9, %10, %11 : vector<16x16xi1>, vector<16x16xf32>
    %c0_8 = arith.constant 0 : index
    %c0_9 = arith.constant 0 : index
    %13 = vector.load %arg0[%c0_8, %c0_9] : memref<16x16xf32, #tpu.memory_space<vmem>>, vector<16x16xf32>
    %c0_10 = arith.constant 0 : index
    %c0_11 = arith.constant 0 : index
    %14 = vector.load %arg1[%c0_10, %c0_11] : memref<16x16xf32, #tpu.memory_space<vmem>>, vector<16x16xf32>
    %15 = arith.addf %13, %14 : vector<16x16xf32>
    %c0_12 = arith.constant 0 : index
    %c0_13 = arith.constant 0 : index
    %16 = vector.load %arg7[%c0_12, %c0_13] : memref<1x16xf32, #tpu.memory_space<vmem>>, vector<1x16xf32>
    %c0_14 = arith.constant 0 : index
    %c0_15 = arith.constant 0 : index
    %17 = vector.load %arg8[%c0_14, %c0_15] : memref<1x16xf32, #tpu.memory_space<vmem>>, vector<1x16xf32>
    %cst_16 = arith.constant dense<0.000000e+00> : vector<16xf32>
    %18 = vector.multi_reduction <add>, %15, %cst_16 [1] : vector<16x16xf32> to vector<16xf32>
    %19 = vector.shape_cast %18 : vector<16xf32> to vector<16x1xf32>
    %cst_17 = arith.constant 1.600000e+01 : f32
    %20 = vector.broadcast %cst_17 : f32 to vector<16x1xf32>
    %21 = arith.divf %19, %20 : vector<16x1xf32>
    %22 = vector.broadcast %21 : vector<16x1xf32> to vector<16x16xf32>
    %23 = arith.subf %15, %22 : vector<16x16xf32>
    %24 = arith.mulf %23, %23 : vector<16x16xf32>
    %cst_18 = arith.constant dense<0.000000e+00> : vector<16xf32>
    %25 = vector.multi_reduction <add>, %24, %cst_18 [1] : vector<16x16xf32> to vector<16xf32>
    %26 = vector.shape_cast %25 : vector<16xf32> to vector<16x1xf32>
    %cst_19 = arith.constant 1.600000e+01 : f32
    %27 = vector.broadcast %cst_19 : f32 to vector<16x1xf32>
    %28 = arith.divf %26, %27 : vector<16x1xf32>
    %29 = vector.broadcast %21 : vector<16x1xf32> to vector<16x16xf32>
    %30 = arith.subf %15, %29 : vector<16x16xf32>
    %cst_20 = arith.constant 9.99999974E-6 : f32
    %31 = vector.broadcast %cst_20 : f32 to vector<16x1xf32>
    %32 = arith.addf %28, %31 : vector<16x1xf32>
    %33 = math.rsqrt %32 : vector<16x1xf32>
    %34 = vector.broadcast %33 : vector<16x1xf32> to vector<16x16xf32>
    %35 = arith.mulf %30, %34 : vector<16x16xf32>
    %36 = vector.broadcast %16 : vector<1x16xf32> to vector<16x16xf32>
    %37 = arith.mulf %35, %36 : vector<16x16xf32>
    %38 = vector.broadcast %17 : vector<1x16xf32> to vector<16x16xf32>
    %39 = arith.addf %37, %38 : vector<16x16xf32>
    %c0_21 = arith.constant 0 : index
    %c0_22 = arith.constant 0 : index
    %40 = vector.load %arg9[%c0_21, %c0_22] : memref<16x32xf32, #tpu.memory_space<vmem>>, vector<16x32xf32>
    %cst_23 = arith.constant dense<0.000000e+00> : vector<16x32xf32>
    %41 = tpu.matmul %39, %40, %cst_23 {dimension_numbers = #tpu.dot_dimension_numbers<[1], [0], [0], [1], [0, 0, 1, 1], [], []>} : vector<16x16xf32>, vector<16x32xf32>, vector<16x32xf32> -> vector<16x32xf32>
    %c0_24 = arith.constant 0 : index
    %c0_25 = arith.constant 0 : index
    %42 = vector.load %arg10[%c0_24, %c0_25] : memref<1x32xf32, #tpu.memory_space<vmem>>, vector<1x32xf32>
    %43 = vector.broadcast %42 : vector<1x32xf32> to vector<16x32xf32>
    %44 = arith.addf %41, %43 : vector<16x32xf32>
    %c0_26 = arith.constant 0 : index
    %c0_27 = arith.constant 0 : index
    %c0_28 = arith.constant 0 : index
    %45 = vector.load %arg11[%c0_26, %c0_27, %c0_28] : memref<2x32x96xf32, #tpu.memory_space<vmem>>, vector<1x32x96xf32>
    %46 = vector.shape_cast %45 : vector<1x32x96xf32> to vector<32x96xf32>
    %cst_29 = arith.constant dense<0.000000e+00> : vector<16x96xf32>
    %47 = tpu.matmul %44, %46, %cst_29 {dimension_numbers = #tpu.dot_dimension_numbers<[1], [0], [0], [1], [0, 0, 1, 1], [], []>} : vector<16x32xf32>, vector<32x96xf32>, vector<16x96xf32> -> vector<16x96xf32>
    %c0_30 = arith.constant 0 : index
    %c0_31 = arith.constant 0 : index
    %c0_32 = arith.constant 0 : index
    %48 = vector.load %arg12[%c0_30, %c0_31, %c0_32] : memref<2x1x96xf32, #tpu.memory_space<vmem>>, vector<1x1x96xf32>
    %49 = vector.shape_cast %48 : vector<1x1x96xf32> to vector<1x96xf32>
    %50 = vector.broadcast %49 : vector<1x96xf32> to vector<16x96xf32>
    %51 = arith.addf %47, %50 : vector<16x96xf32>
    %52 = vector.extract_strided_slice %51 {offsets = [0, 0], sizes = [16, 8], strides = [1, 1]} : vector<16x96xf32> to vector<16x8xf32>
    %53 = vector.extract_strided_slice %51 {offsets = [0, 8], sizes = [16, 8], strides = [1, 1]} : vector<16x96xf32> to vector<16x8xf32>
    %54 = vector.extract_strided_slice %51 {offsets = [0, 16], sizes = [16, 8], strides = [1, 1]} : vector<16x96xf32> to vector<16x8xf32>
    %55 = vector.extract_strided_slice %51 {offsets = [0, 24], sizes = [16, 8], strides = [1, 1]} : vector<16x96xf32> to vector<16x8xf32>
    %56 = vector.shape_cast %52 : vector<16x8xf32> to vector<1x16x8xf32>
    %57 = vector.shape_cast %53 : vector<16x8xf32> to vector<1x16x8xf32>
    %58 = vector.shape_cast %54 : vector<16x8xf32> to vector<1x16x8xf32>
    %59 = vector.shape_cast %55 : vector<16x8xf32> to vector<1x16x8xf32>
    %60 = tpu.concatenate %56, %57, %58, %59 in 0 : vector<1x16x8xf32>, vector<1x16x8xf32>, vector<1x16x8xf32>, vector<1x16x8xf32> -> vector<4x16x8xf32>
    %61 = vector.extract_strided_slice %51 {offsets = [0, 32], sizes = [16, 8], strides = [1, 1]} : vector<16x96xf32> to vector<16x8xf32>
    %62 = vector.extract_strided_slice %51 {offsets = [0, 40], sizes = [16, 8], strides = [1, 1]} : vector<16x96xf32> to vector<16x8xf32>
    %63 = vector.extract_strided_slice %51 {offsets = [0, 48], sizes = [16, 8], strides = [1, 1]} : vector<16x96xf32> to vector<16x8xf32>
    %64 = vector.extract_strided_slice %51 {offsets = [0, 56], sizes = [16, 8], strides = [1, 1]} : vector<16x96xf32> to vector<16x8xf32>
    %65 = vector.shape_cast %61 : vector<16x8xf32> to vector<1x16x8xf32>
    %66 = vector.shape_cast %62 : vector<16x8xf32> to vector<1x16x8xf32>
    %67 = vector.shape_cast %63 : vector<16x8xf32> to vector<1x16x8xf32>
    %68 = vector.shape_cast %64 : vector<16x8xf32> to vector<1x16x8xf32>
    %69 = tpu.concatenate %65, %66, %67, %68 in 0 : vector<1x16x8xf32>, vector<1x16x8xf32>, vector<1x16x8xf32>, vector<1x16x8xf32> -> vector<4x16x8xf32>
    %70 = vector.extract_strided_slice %51 {offsets = [0, 64], sizes = [16, 8], strides = [1, 1]} : vector<16x96xf32> to vector<16x8xf32>
    %71 = vector.extract_strided_slice %51 {offsets = [0, 72], sizes = [16, 8], strides = [1, 1]} : vector<16x96xf32> to vector<16x8xf32>
    %72 = vector.extract_strided_slice %51 {offsets = [0, 80], sizes = [16, 8], strides = [1, 1]} : vector<16x96xf32> to vector<16x8xf32>
    %73 = vector.extract_strided_slice %51 {offsets = [0, 88], sizes = [16, 8], strides = [1, 1]} : vector<16x96xf32> to vector<16x8xf32>
    %74 = vector.shape_cast %70 : vector<16x8xf32> to vector<1x16x8xf32>
    %75 = vector.shape_cast %71 : vector<16x8xf32> to vector<1x16x8xf32>
    %76 = vector.shape_cast %72 : vector<16x8xf32> to vector<1x16x8xf32>
    %77 = vector.shape_cast %73 : vector<16x8xf32> to vector<1x16x8xf32>
    %78 = tpu.concatenate %74, %75, %76, %77 in 0 : vector<1x16x8xf32>, vector<1x16x8xf32>, vector<1x16x8xf32>, vector<1x16x8xf32> -> vector<4x16x8xf32>
    "tpu.trace_start"() <{level = 10 : i32, message = "hqd,hkd->hqk"}> : () -> ()
    %cst_33 = arith.constant dense<0.000000e+00> : vector<4x16x16xf32>
    %79 = tpu.matmul %60, %69, %cst_33 {dimension_numbers = #tpu.dot_dimension_numbers<[2], [2], [1], [1], [0, 0, 0, 1, 1, 1], [0], [0]>} : vector<4x16x8xf32>, vector<4x16x8xf32>, vector<4x16x16xf32> -> vector<4x16x16xf32>
    "tpu.trace_stop"() : () -> ()
    %c0_34 = arith.constant 0 : index
    %c0_35 = arith.constant 0 : index
    %c0_36 = arith.constant 0 : index
    %c0_37 = arith.constant 0 : index
    %80 = vector.load %arg6[%c0_34, %c0_35, %c0_36, %c0_37] : memref<2x4x16x16xf32, #tpu.memory_space<vmem>>, vector<1x4x16x16xf32>
    %81 = vector.shape_cast %80 : vector<1x4x16x16xf32> to vector<4x16x16xf32>
    %82 = arith.addf %79, %81 : vector<4x16x16xf32>
    %cst_38 = arith.constant 1.000000e+00 : f32
    %83 = vector.broadcast %cst_38 : f32 to vector<4x16x16xf32>
    %84 = arith.mulf %82, %83 : vector<4x16x16xf32>
    %85 = vector.shape_cast %12 : vector<16x16xf32> to vector<1x16x16xf32>
    %86 = vector.broadcast %85 : vector<1x16x16xf32> to vector<4x16x16xf32>
    %87 = arith.addf %84, %86 : vector<4x16x16xf32>
    %cst_39 = arith.constant dense<0xFF800000> : vector<4x16xf32>
    %88 = vector.multi_reduction <maximumf>, %87, %cst_39 [2] : vector<4x16x16xf32> to vector<4x16xf32>
    %89 = vector.shape_cast %88 : vector<4x16xf32> to vector<4x16x1xf32>
    %90 = vector.broadcast %89 : vector<4x16x1xf32> to vector<4x16x16xf32>
    %91 = arith.subf %87, %90 : vector<4x16x16xf32>
    %92 = math.exp %91 : vector<4x16x16xf32>
    %cst_40 = arith.constant dense<0.000000e+00> : vector<4x16xf32>
    %93 = vector.multi_reduction <add>, %92, %cst_40 [2] : vector<4x16x16xf32> to vector<4x16xf32>
    %94 = vector.shape_cast %93 : vector<4x16xf32> to vector<4x16x1xf32>
    %95 = vector.broadcast %94 : vector<4x16x1xf32> to vector<4x16x16xf32>
    %96 = arith.divf %92, %95 : vector<4x16x16xf32>
    %97 = vector.shape_cast %4 : vector<16x16xf32> to vector<1x16x16xf32>
    %98 = vector.broadcast %97 : vector<1x16x16xf32> to vector<4x16x16xf32>
    %99 = arith.mulf %96, %98 : vector<4x16x16xf32>
    "tpu.trace_start"() <{level = 10 : i32, message = "hqk,hkd->hqd"}> : () -> ()
    %cst_41 = arith.constant dense<0.000000e+00> : vector<4x16x8xf32>
    %100 = tpu.matmul %99, %78, %cst_41 {dimension_numbers = #tpu.dot_dimension_numbers<[2], [1], [1], [2], [0, 0, 0, 1, 1, 2], [0], [0]>} : vector<4x16x16xf32>, vector<4x16x8xf32>, vector<4x16x8xf32> -> vector<4x16x8xf32>
    "tpu.trace_stop"() : () -> ()
    %101 = vector.extract_strided_slice %100 {offsets = [0, 0, 0], sizes = [1, 16, 8], strides = [1, 1, 1]} : vector<4x16x8xf32> to vector<1x16x8xf32>
    %102 = vector.shape_cast %101 : vector<1x16x8xf32> to vector<16x8xf32>
    %103 = vector.extract_strided_slice %100 {offsets = [1, 0, 0], sizes = [1, 16, 8], strides = [1, 1, 1]} : vector<4x16x8xf32> to vector<1x16x8xf32>
    %104 = vector.shape_cast %103 : vector<1x16x8xf32> to vector<16x8xf32>
    %105 = vector.extract_strided_slice %100 {offsets = [2, 0, 0], sizes = [1, 16, 8], strides = [1, 1, 1]} : vector<4x16x8xf32> to vector<1x16x8xf32>
    %106 = vector.shape_cast %105 : vector<1x16x8xf32> to vector<16x8xf32>
    %107 = vector.extract_strided_slice %100 {offsets = [3, 0, 0], sizes = [1, 16, 8], strides = [1, 1, 1]} : vector<4x16x8xf32> to vector<1x16x8xf32>
    %108 = vector.shape_cast %107 : vector<1x16x8xf32> to vector<16x8xf32>
    %109 = tpu.concatenate %102, %104, %106, %108 in 1 : vector<16x8xf32>, vector<16x8xf32>, vector<16x8xf32>, vector<16x8xf32> -> vector<16x32xf32>
    %c0_42 = arith.constant 0 : index
    %c0_43 = arith.constant 0 : index
    %c0_44 = arith.constant 0 : index
    %110 = vector.load %arg13[%c0_42, %c0_43, %c0_44] : memref<2x32x32xf32, #tpu.memory_space<vmem>>, vector<1x32x32xf32>
    %111 = vector.shape_cast %110 : vector<1x32x32xf32> to vector<32x32xf32>
    %cst_45 = arith.constant dense<0.000000e+00> : vector<16x32xf32>
    %112 = tpu.matmul %109, %111, %cst_45 {dimension_numbers = #tpu.dot_dimension_numbers<[1], [0], [0], [1], [0, 0, 1, 1], [], []>} : vector<16x32xf32>, vector<32x32xf32>, vector<16x32xf32> -> vector<16x32xf32>
    %c0_46 = arith.constant 0 : index
    %c0_47 = arith.constant 0 : index
    %c0_48 = arith.constant 0 : index
    %113 = vector.load %arg14[%c0_46, %c0_47, %c0_48] : memref<2x1x32xf32, #tpu.memory_space<vmem>>, vector<1x1x32xf32>
    %114 = vector.shape_cast %113 : vector<1x1x32xf32> to vector<1x32xf32>
    %115 = vector.broadcast %114 : vector<1x32xf32> to vector<16x32xf32>
    %116 = arith.addf %112, %115 : vector<16x32xf32>
    %117 = arith.addf %116, %44 : vector<16x32xf32>
    %c0_49 = arith.constant 0 : index
    %c0_50 = arith.constant 0 : index
    %c0_51 = arith.constant 0 : index
    %118 = vector.load %arg15[%c0_49, %c0_50, %c0_51] : memref<2x1x32xf32, #tpu.memory_space<vmem>>, vector<1x1x32xf32>
    %119 = vector.shape_cast %118 : vector<1x1x32xf32> to vector<1x32xf32>
    %c0_52 = arith.constant 0 : index
    %c0_53 = arith.constant 0 : index
    %c0_54 = arith.constant 0 : index
    %120 = vector.load %arg16[%c0_52, %c0_53, %c0_54] : memref<2x1x32xf32, #tpu.memory_space<vmem>>, vector<1x1x32xf32>
    %121 = vector.shape_cast %120 : vector<1x1x32xf32> to vector<1x32xf32>
    %cst_55 = arith.constant dense<0.000000e+00> : vector<16xf32>
    %122 = vector.multi_reduction <add>, %117, %cst_55 [1] : vector<16x32xf32> to vector<16xf32>
    %123 = vector.shape_cast %122 : vector<16xf32> to vector<16x1xf32>
    %cst_56 = arith.constant 3.200000e+01 : f32
    %124 = vector.broadcast %cst_56 : f32 to vector<16x1xf32>
    %125 = arith.divf %123, %124 : vector<16x1xf32>
    %126 = vector.broadcast %125 : vector<16x1xf32> to vector<16x32xf32>
    %127 = arith.subf %117, %126 : vector<16x32xf32>
    %128 = arith.mulf %127, %127 : vector<16x32xf32>
    %cst_57 = arith.constant dense<0.000000e+00> : vector<16xf32>
    %129 = vector.multi_reduction <add>, %128, %cst_57 [1] : vector<16x32xf32> to vector<16xf32>
    %130 = vector.shape_cast %129 : vector<16xf32> to vector<16x1xf32>
    %cst_58 = arith.constant 3.200000e+01 : f32
    %131 = vector.broadcast %cst_58 : f32 to vector<16x1xf32>
    %132 = arith.divf %130, %131 : vector<16x1xf32>
    %133 = vector.broadcast %125 : vector<16x1xf32> to vector<16x32xf32>
    %134 = arith.subf %117, %133 : vector<16x32xf32>
    %cst_59 = arith.constant 9.99999974E-6 : f32
    %135 = vector.broadcast %cst_59 : f32 to vector<16x1xf32>
    %136 = arith.addf %132, %135 : vector<16x1xf32>
    %137 = math.rsqrt %136 : vector<16x1xf32>
    %138 = vector.broadcast %137 : vector<16x1xf32> to vector<16x32xf32>
    %139 = arith.mulf %134, %138 : vector<16x32xf32>
    %140 = vector.broadcast %119 : vector<1x32xf32> to vector<16x32xf32>
    %141 = arith.mulf %139, %140 : vector<16x32xf32>
    %142 = vector.broadcast %121 : vector<1x32xf32> to vector<16x32xf32>
    %143 = arith.addf %141, %142 : vector<16x32xf32>
    %c0_60 = arith.constant 0 : index
    %c0_61 = arith.constant 0 : index
    %c0_62 = arith.constant 0 : index
    %144 = vector.load %arg17[%c0_60, %c0_61, %c0_62] : memref<2x32x64xf32, #tpu.memory_space<vmem>>, vector<1x32x64xf32>
    %145 = vector.shape_cast %144 : vector<1x32x64xf32> to vector<32x64xf32>
    %cst_63 = arith.constant dense<0.000000e+00> : vector<16x64xf32>
    %146 = tpu.matmul %143, %145, %cst_63 {dimension_numbers = #tpu.dot_dimension_numbers<[1], [0], [0], [1], [0, 0, 1, 1], [], []>} : vector<16x32xf32>, vector<32x64xf32>, vector<16x64xf32> -> vector<16x64xf32>
    %c0_64 = arith.constant 0 : index
    %c0_65 = arith.constant 0 : index
    %c0_66 = arith.constant 0 : index
    %147 = vector.load %arg18[%c0_64, %c0_65, %c0_66] : memref<2x1x64xf32, #tpu.memory_space<vmem>>, vector<1x1x64xf32>
    %148 = vector.shape_cast %147 : vector<1x1x64xf32> to vector<1x64xf32>
    %149 = vector.broadcast %148 : vector<1x64xf32> to vector<16x64xf32>
    %150 = arith.addf %146, %149 : vector<16x64xf32>
    %cst_67 = arith.constant 5.000000e-01 : f32
    %151 = vector.broadcast %cst_67 : f32 to vector<16x64xf32>
    %152 = arith.mulf %151, %150 : vector<16x64xf32>
    %cst_68 = arith.constant 0.707106769 : f32
    %153 = vector.broadcast %cst_68 : f32 to vector<16x64xf32>
    %154 = arith.mulf %150, %153 : vector<16x64xf32>
    %cst_69 = arith.constant 0.000000e+00 : f32
    %155 = vector.broadcast %cst_69 : f32 to vector<16x64xf32>
    %156 = arith.cmpf oge, %154, %155 : vector<16x64xf32>
    %cst_70 = arith.constant 1.000000e+00 : f32
    %cst_71 = arith.constant -1.000000e+00 : f32
    %157 = vector.broadcast %cst_70 : f32 to vector<16x64xf32>
    %158 = vector.broadcast %cst_71 : f32 to vector<16x64xf32>
    %159 = arith.select %156, %157, %158 : vector<16x64xi1>, vector<16x64xf32>
    %160 = math.absf %154 : vector<16x64xf32>
    %cst_72 = arith.constant 0.327591091 : f32
    %161 = vector.broadcast %cst_72 : f32 to vector<16x64xf32>
    %162 = arith.mulf %161, %160 : vector<16x64xf32>
    %cst_73 = arith.constant 1.000000e+00 : f32
    %163 = vector.broadcast %cst_73 : f32 to vector<16x64xf32>
    %164 = arith.addf %163, %162 : vector<16x64xf32>
    %cst_74 = arith.constant 1.000000e+00 : f32
    %165 = vector.broadcast %cst_74 : f32 to vector<16x64xf32>
    %166 = arith.divf %165, %164 : vector<16x64xf32>
    %cst_75 = arith.constant 1.06140542 : f32
    %167 = vector.broadcast %cst_75 : f32 to vector<16x64xf32>
    %168 = arith.mulf %167, %166 : vector<16x64xf32>
    %cst_76 = arith.constant -1.45315206 : f32
    %169 = vector.broadcast %cst_76 : f32 to vector<16x64xf32>
    %170 = arith.addf %168, %169 : vector<16x64xf32>
    %171 = arith.mulf %170, %166 : vector<16x64xf32>
    %cst_77 = arith.constant 1.42141378 : f32
    %172 = vector.broadcast %cst_77 : f32 to vector<16x64xf32>
    %173 = arith.addf %171, %172 : vector<16x64xf32>
    %174 = arith.mulf %173, %166 : vector<16x64xf32>
    %cst_78 = arith.constant -0.284496725 : f32
    %175 = vector.broadcast %cst_78 : f32 to vector<16x64xf32>
    %176 = arith.addf %174, %175 : vector<16x64xf32>
    %177 = arith.mulf %176, %166 : vector<16x64xf32>
    %cst_79 = arith.constant 0.254829586 : f32
    %178 = vector.broadcast %cst_79 : f32 to vector<16x64xf32>
    %179 = arith.addf %177, %178 : vector<16x64xf32>
    %180 = arith.mulf %179, %166 : vector<16x64xf32>
    %cst_80 = arith.constant 0.000000e+00 : f32
    %181 = vector.broadcast %cst_80 : f32 to vector<16x64xf32>
    %182 = arith.subf %181, %160 : vector<16x64xf32>
    %183 = arith.mulf %182, %160 : vector<16x64xf32>
    %184 = math.exp %183 : vector<16x64xf32>
    %185 = arith.mulf %180, %184 : vector<16x64xf32>
    %cst_81 = arith.constant 1.000000e+00 : f32
    %186 = vector.broadcast %cst_81 : f32 to vector<16x64xf32>
    %187 = arith.subf %186, %185 : vector<16x64xf32>
    %188 = arith.mulf %159, %187 : vector<16x64xf32>
    %cst_82 = arith.constant 1.000000e+00 : f32
    %189 = vector.broadcast %cst_82 : f32 to vector<16x64xf32>
    %190 = arith.addf %189, %188 : vector<16x64xf32>
    %191 = arith.mulf %152, %190 : vector<16x64xf32>
    %c0_83 = arith.constant 0 : index
    %c0_84 = arith.constant 0 : index
    %c0_85 = arith.constant 0 : index
    %192 = vector.load %arg19[%c0_83, %c0_84, %c0_85] : memref<2x64x32xf32, #tpu.memory_space<vmem>>, vector<1x64x32xf32>
    %193 = vector.shape_cast %192 : vector<1x64x32xf32> to vector<64x32xf32>
    %cst_86 = arith.constant dense<0.000000e+00> : vector<16x32xf32>
    %194 = tpu.matmul %191, %193, %cst_86 {dimension_numbers = #tpu.dot_dimension_numbers<[1], [0], [0], [1], [0, 0, 1, 1], [], []>} : vector<16x64xf32>, vector<64x32xf32>, vector<16x32xf32> -> vector<16x32xf32>
    %c0_87 = arith.constant 0 : index
    %c0_88 = arith.constant 0 : index
    %c0_89 = arith.constant 0 : index
    %195 = vector.load %arg20[%c0_87, %c0_88, %c0_89] : memref<2x1x32xf32, #tpu.memory_space<vmem>>, vector<1x1x32xf32>
    %196 = vector.shape_cast %195 : vector<1x1x32xf32> to vector<1x32xf32>
    %197 = vector.broadcast %196 : vector<1x32xf32> to vector<16x32xf32>
    %198 = arith.addf %194, %197 : vector<16x32xf32>
    %199 = arith.addf %198, %143 : vector<16x32xf32>
    %c0_90 = arith.constant 0 : index
    %c0_91 = arith.constant 0 : index
    %c0_92 = arith.constant 0 : index
    %200 = vector.load %arg21[%c0_90, %c0_91, %c0_92] : memref<2x1x32xf32, #tpu.memory_space<vmem>>, vector<1x1x32xf32>
    %201 = vector.shape_cast %200 : vector<1x1x32xf32> to vector<1x32xf32>
    %c0_93 = arith.constant 0 : index
    %c0_94 = arith.constant 0 : index
    %c0_95 = arith.constant 0 : index
    %202 = vector.load %arg22[%c0_93, %c0_94, %c0_95] : memref<2x1x32xf32, #tpu.memory_space<vmem>>, vector<1x1x32xf32>
    %203 = vector.shape_cast %202 : vector<1x1x32xf32> to vector<1x32xf32>
    %cst_96 = arith.constant dense<0.000000e+00> : vector<16xf32>
    %204 = vector.multi_reduction <add>, %199, %cst_96 [1] : vector<16x32xf32> to vector<16xf32>
    %205 = vector.shape_cast %204 : vector<16xf32> to vector<16x1xf32>
    %cst_97 = arith.constant 3.200000e+01 : f32
    %206 = vector.broadcast %cst_97 : f32 to vector<16x1xf32>
    %207 = arith.divf %205, %206 : vector<16x1xf32>
    %208 = vector.broadcast %207 : vector<16x1xf32> to vector<16x32xf32>
    %209 = arith.subf %199, %208 : vector<16x32xf32>
    %210 = arith.mulf %209, %209 : vector<16x32xf32>
    %cst_98 = arith.constant dense<0.000000e+00> : vector<16xf32>
    %211 = vector.multi_reduction <add>, %210, %cst_98 [1] : vector<16x32xf32> to vector<16xf32>
    %212 = vector.shape_cast %211 : vector<16xf32> to vector<16x1xf32>
    %cst_99 = arith.constant 3.200000e+01 : f32
    %213 = vector.broadcast %cst_99 : f32 to vector<16x1xf32>
    %214 = arith.divf %212, %213 : vector<16x1xf32>
    %215 = vector.broadcast %207 : vector<16x1xf32> to vector<16x32xf32>
    %216 = arith.subf %199, %215 : vector<16x32xf32>
    %cst_100 = arith.constant 9.99999974E-6 : f32
    %217 = vector.broadcast %cst_100 : f32 to vector<16x1xf32>
    %218 = arith.addf %214, %217 : vector<16x1xf32>
    %219 = math.rsqrt %218 : vector<16x1xf32>
    %220 = vector.broadcast %219 : vector<16x1xf32> to vector<16x32xf32>
    %221 = arith.mulf %216, %220 : vector<16x32xf32>
    %222 = vector.broadcast %201 : vector<1x32xf32> to vector<16x32xf32>
    %223 = arith.mulf %221, %222 : vector<16x32xf32>
    %224 = vector.broadcast %203 : vector<1x32xf32> to vector<16x32xf32>
    %225 = arith.addf %223, %224 : vector<16x32xf32>
    %c1 = arith.constant 1 : index
    %c0_101 = arith.constant 0 : index
    %c0_102 = arith.constant 0 : index
    %226 = vector.load %arg11[%c1, %c0_101, %c0_102] : memref<2x32x96xf32, #tpu.memory_space<vmem>>, vector<1x32x96xf32>
    %227 = vector.shape_cast %226 : vector<1x32x96xf32> to vector<32x96xf32>
    %cst_103 = arith.constant dense<0.000000e+00> : vector<16x96xf32>
    %228 = tpu.matmul %225, %227, %cst_103 {dimension_numbers = #tpu.dot_dimension_numbers<[1], [0], [0], [1], [0, 0, 1, 1], [], []>} : vector<16x32xf32>, vector<32x96xf32>, vector<16x96xf32> -> vector<16x96xf32>
    %c1_104 = arith.constant 1 : index
    %c0_105 = arith.constant 0 : index
    %c0_106 = arith.constant 0 : index
    %229 = vector.load %arg12[%c1_104, %c0_105, %c0_106] : memref<2x1x96xf32, #tpu.memory_space<vmem>>, vector<1x1x96xf32>
    %230 = vector.shape_cast %229 : vector<1x1x96xf32> to vector<1x96xf32>
    %231 = vector.broadcast %230 : vector<1x96xf32> to vector<16x96xf32>
    %232 = arith.addf %228, %231 : vector<16x96xf32>
    %233 = vector.extract_strided_slice %232 {offsets = [0, 0], sizes = [16, 8], strides = [1, 1]} : vector<16x96xf32> to vector<16x8xf32>
    %234 = vector.extract_strided_slice %232 {offsets = [0, 8], sizes = [16, 8], strides = [1, 1]} : vector<16x96xf32> to vector<16x8xf32>
    %235 = vector.extract_strided_slice %232 {offsets = [0, 16], sizes = [16, 8], strides = [1, 1]} : vector<16x96xf32> to vector<16x8xf32>
    %236 = vector.extract_strided_slice %232 {offsets = [0, 24], sizes = [16, 8], strides = [1, 1]} : vector<16x96xf32> to vector<16x8xf32>
    %237 = vector.shape_cast %233 : vector<16x8xf32> to vector<1x16x8xf32>
    %238 = vector.shape_cast %234 : vector<16x8xf32> to vector<1x16x8xf32>
    %239 = vector.shape_cast %235 : vector<16x8xf32> to vector<1x16x8xf32>
    %240 = vector.shape_cast %236 : vector<16x8xf32> to vector<1x16x8xf32>
    %241 = tpu.concatenate %237, %238, %239, %240 in 0 : vector<1x16x8xf32>, vector<1x16x8xf32>, vector<1x16x8xf32>, vector<1x16x8xf32> -> vector<4x16x8xf32>
    %242 = vector.extract_strided_slice %232 {offsets = [0, 32], sizes = [16, 8], strides = [1, 1]} : vector<16x96xf32> to vector<16x8xf32>
    %243 = vector.extract_strided_slice %232 {offsets = [0, 40], sizes = [16, 8], strides = [1, 1]} : vector<16x96xf32> to vector<16x8xf32>
    %244 = vector.extract_strided_slice %232 {offsets = [0, 48], sizes = [16, 8], strides = [1, 1]} : vector<16x96xf32> to vector<16x8xf32>
    %245 = vector.extract_strided_slice %232 {offsets = [0, 56], sizes = [16, 8], strides = [1, 1]} : vector<16x96xf32> to vector<16x8xf32>
    %246 = vector.shape_cast %242 : vector<16x8xf32> to vector<1x16x8xf32>
    %247 = vector.shape_cast %243 : vector<16x8xf32> to vector<1x16x8xf32>
    %248 = vector.shape_cast %244 : vector<16x8xf32> to vector<1x16x8xf32>
    %249 = vector.shape_cast %245 : vector<16x8xf32> to vector<1x16x8xf32>
    %250 = tpu.concatenate %246, %247, %248, %249 in 0 : vector<1x16x8xf32>, vector<1x16x8xf32>, vector<1x16x8xf32>, vector<1x16x8xf32> -> vector<4x16x8xf32>
    %251 = vector.extract_strided_slice %232 {offsets = [0, 64], sizes = [16, 8], strides = [1, 1]} : vector<16x96xf32> to vector<16x8xf32>
    %252 = vector.extract_strided_slice %232 {offsets = [0, 72], sizes = [16, 8], strides = [1, 1]} : vector<16x96xf32> to vector<16x8xf32>
    %253 = vector.extract_strided_slice %232 {offsets = [0, 80], sizes = [16, 8], strides = [1, 1]} : vector<16x96xf32> to vector<16x8xf32>
    %254 = vector.extract_strided_slice %232 {offsets = [0, 88], sizes = [16, 8], strides = [1, 1]} : vector<16x96xf32> to vector<16x8xf32>
    %255 = vector.shape_cast %251 : vector<16x8xf32> to vector<1x16x8xf32>
    %256 = vector.shape_cast %252 : vector<16x8xf32> to vector<1x16x8xf32>
    %257 = vector.shape_cast %253 : vector<16x8xf32> to vector<1x16x8xf32>
    %258 = vector.shape_cast %254 : vector<16x8xf32> to vector<1x16x8xf32>
    %259 = tpu.concatenate %255, %256, %257, %258 in 0 : vector<1x16x8xf32>, vector<1x16x8xf32>, vector<1x16x8xf32>, vector<1x16x8xf32> -> vector<4x16x8xf32>
    "tpu.trace_start"() <{level = 10 : i32, message = "hqd,hkd->hqk"}> : () -> ()
    %cst_107 = arith.constant dense<0.000000e+00> : vector<4x16x16xf32>
    %260 = tpu.matmul %241, %250, %cst_107 {dimension_numbers = #tpu.dot_dimension_numbers<[2], [2], [1], [1], [0, 0, 0, 1, 1, 1], [0], [0]>} : vector<4x16x8xf32>, vector<4x16x8xf32>, vector<4x16x16xf32> -> vector<4x16x16xf32>
    "tpu.trace_stop"() : () -> ()
    %c1_108 = arith.constant 1 : index
    %c0_109 = arith.constant 0 : index
    %c0_110 = arith.constant 0 : index
    %c0_111 = arith.constant 0 : index
    %261 = vector.load %arg6[%c1_108, %c0_109, %c0_110, %c0_111] : memref<2x4x16x16xf32, #tpu.memory_space<vmem>>, vector<1x4x16x16xf32>
    %262 = vector.shape_cast %261 : vector<1x4x16x16xf32> to vector<4x16x16xf32>
    %263 = arith.addf %260, %262 : vector<4x16x16xf32>
    %cst_112 = arith.constant 1.000000e+00 : f32
    %264 = vector.broadcast %cst_112 : f32 to vector<4x16x16xf32>
    %265 = arith.mulf %263, %264 : vector<4x16x16xf32>
    %266 = vector.shape_cast %12 : vector<16x16xf32> to vector<1x16x16xf32>
    %267 = vector.broadcast %266 : vector<1x16x16xf32> to vector<4x16x16xf32>
    %268 = arith.addf %265, %267 : vector<4x16x16xf32>
    %cst_113 = arith.constant dense<0xFF800000> : vector<4x16xf32>
    %269 = vector.multi_reduction <maximumf>, %268, %cst_113 [2] : vector<4x16x16xf32> to vector<4x16xf32>
    %270 = vector.shape_cast %269 : vector<4x16xf32> to vector<4x16x1xf32>
    %271 = vector.broadcast %270 : vector<4x16x1xf32> to vector<4x16x16xf32>
    %272 = arith.subf %268, %271 : vector<4x16x16xf32>
    %273 = math.exp %272 : vector<4x16x16xf32>
    %cst_114 = arith.constant dense<0.000000e+00> : vector<4x16xf32>
    %274 = vector.multi_reduction <add>, %273, %cst_114 [2] : vector<4x16x16xf32> to vector<4x16xf32>
    %275 = vector.shape_cast %274 : vector<4x16xf32> to vector<4x16x1xf32>
    %276 = vector.broadcast %275 : vector<4x16x1xf32> to vector<4x16x16xf32>
    %277 = arith.divf %273, %276 : vector<4x16x16xf32>
    %278 = vector.shape_cast %4 : vector<16x16xf32> to vector<1x16x16xf32>
    %279 = vector.broadcast %278 : vector<1x16x16xf32> to vector<4x16x16xf32>
    %280 = arith.mulf %277, %279 : vector<4x16x16xf32>
    "tpu.trace_start"() <{level = 10 : i32, message = "hqk,hkd->hqd"}> : () -> ()
    %cst_115 = arith.constant dense<0.000000e+00> : vector<4x16x8xf32>
    %281 = tpu.matmul %280, %259, %cst_115 {dimension_numbers = #tpu.dot_dimension_numbers<[2], [1], [1], [2], [0, 0, 0, 1, 1, 2], [0], [0]>} : vector<4x16x16xf32>, vector<4x16x8xf32>, vector<4x16x8xf32> -> vector<4x16x8xf32>
    "tpu.trace_stop"() : () -> ()
    %282 = vector.extract_strided_slice %281 {offsets = [0, 0, 0], sizes = [1, 16, 8], strides = [1, 1, 1]} : vector<4x16x8xf32> to vector<1x16x8xf32>
    %283 = vector.shape_cast %282 : vector<1x16x8xf32> to vector<16x8xf32>
    %284 = vector.extract_strided_slice %281 {offsets = [1, 0, 0], sizes = [1, 16, 8], strides = [1, 1, 1]} : vector<4x16x8xf32> to vector<1x16x8xf32>
    %285 = vector.shape_cast %284 : vector<1x16x8xf32> to vector<16x8xf32>
    %286 = vector.extract_strided_slice %281 {offsets = [2, 0, 0], sizes = [1, 16, 8], strides = [1, 1, 1]} : vector<4x16x8xf32> to vector<1x16x8xf32>
    %287 = vector.shape_cast %286 : vector<1x16x8xf32> to vector<16x8xf32>
    %288 = vector.extract_strided_slice %281 {offsets = [3, 0, 0], sizes = [1, 16, 8], strides = [1, 1, 1]} : vector<4x16x8xf32> to vector<1x16x8xf32>
    %289 = vector.shape_cast %288 : vector<1x16x8xf32> to vector<16x8xf32>
    %290 = tpu.concatenate %283, %285, %287, %289 in 1 : vector<16x8xf32>, vector<16x8xf32>, vector<16x8xf32>, vector<16x8xf32> -> vector<16x32xf32>
    %c1_116 = arith.constant 1 : index
    %c0_117 = arith.constant 0 : index
    %c0_118 = arith.constant 0 : index
    %291 = vector.load %arg13[%c1_116, %c0_117, %c0_118] : memref<2x32x32xf32, #tpu.memory_space<vmem>>, vector<1x32x32xf32>
    %292 = vector.shape_cast %291 : vector<1x32x32xf32> to vector<32x32xf32>
    %cst_119 = arith.constant dense<0.000000e+00> : vector<16x32xf32>
    %293 = tpu.matmul %290, %292, %cst_119 {dimension_numbers = #tpu.dot_dimension_numbers<[1], [0], [0], [1], [0, 0, 1, 1], [], []>} : vector<16x32xf32>, vector<32x32xf32>, vector<16x32xf32> -> vector<16x32xf32>
    %c1_120 = arith.constant 1 : index
    %c0_121 = arith.constant 0 : index
    %c0_122 = arith.constant 0 : index
    %294 = vector.load %arg14[%c1_120, %c0_121, %c0_122] : memref<2x1x32xf32, #tpu.memory_space<vmem>>, vector<1x1x32xf32>
    %295 = vector.shape_cast %294 : vector<1x1x32xf32> to vector<1x32xf32>
    %296 = vector.broadcast %295 : vector<1x32xf32> to vector<16x32xf32>
    %297 = arith.addf %293, %296 : vector<16x32xf32>
    %298 = arith.addf %297, %225 : vector<16x32xf32>
    %c1_123 = arith.constant 1 : index
    %c0_124 = arith.constant 0 : index
    %c0_125 = arith.constant 0 : index
    %299 = vector.load %arg15[%c1_123, %c0_124, %c0_125] : memref<2x1x32xf32, #tpu.memory_space<vmem>>, vector<1x1x32xf32>
    %300 = vector.shape_cast %299 : vector<1x1x32xf32> to vector<1x32xf32>
    %c1_126 = arith.constant 1 : index
    %c0_127 = arith.constant 0 : index
    %c0_128 = arith.constant 0 : index
    %301 = vector.load %arg16[%c1_126, %c0_127, %c0_128] : memref<2x1x32xf32, #tpu.memory_space<vmem>>, vector<1x1x32xf32>
    %302 = vector.shape_cast %301 : vector<1x1x32xf32> to vector<1x32xf32>
    %cst_129 = arith.constant dense<0.000000e+00> : vector<16xf32>
    %303 = vector.multi_reduction <add>, %298, %cst_129 [1] : vector<16x32xf32> to vector<16xf32>
    %304 = vector.shape_cast %303 : vector<16xf32> to vector<16x1xf32>
    %cst_130 = arith.constant 3.200000e+01 : f32
    %305 = vector.broadcast %cst_130 : f32 to vector<16x1xf32>
    %306 = arith.divf %304, %305 : vector<16x1xf32>
    %307 = vector.broadcast %306 : vector<16x1xf32> to vector<16x32xf32>
    %308 = arith.subf %298, %307 : vector<16x32xf32>
    %309 = arith.mulf %308, %308 : vector<16x32xf32>
    %cst_131 = arith.constant dense<0.000000e+00> : vector<16xf32>
    %310 = vector.multi_reduction <add>, %309, %cst_131 [1] : vector<16x32xf32> to vector<16xf32>
    %311 = vector.shape_cast %310 : vector<16xf32> to vector<16x1xf32>
    %cst_132 = arith.constant 3.200000e+01 : f32
    %312 = vector.broadcast %cst_132 : f32 to vector<16x1xf32>
    %313 = arith.divf %311, %312 : vector<16x1xf32>
    %314 = vector.broadcast %306 : vector<16x1xf32> to vector<16x32xf32>
    %315 = arith.subf %298, %314 : vector<16x32xf32>
    %cst_133 = arith.constant 9.99999974E-6 : f32
    %316 = vector.broadcast %cst_133 : f32 to vector<16x1xf32>
    %317 = arith.addf %313, %316 : vector<16x1xf32>
    %318 = math.rsqrt %317 : vector<16x1xf32>
    %319 = vector.broadcast %318 : vector<16x1xf32> to vector<16x32xf32>
    %320 = arith.mulf %315, %319 : vector<16x32xf32>
    %321 = vector.broadcast %300 : vector<1x32xf32> to vector<16x32xf32>
    %322 = arith.mulf %320, %321 : vector<16x32xf32>
    %323 = vector.broadcast %302 : vector<1x32xf32> to vector<16x32xf32>
    %324 = arith.addf %322, %323 : vector<16x32xf32>
    %c1_134 = arith.constant 1 : index
    %c0_135 = arith.constant 0 : index
    %c0_136 = arith.constant 0 : index
    %325 = vector.load %arg17[%c1_134, %c0_135, %c0_136] : memref<2x32x64xf32, #tpu.memory_space<vmem>>, vector<1x32x64xf32>
    %326 = vector.shape_cast %325 : vector<1x32x64xf32> to vector<32x64xf32>
    %cst_137 = arith.constant dense<0.000000e+00> : vector<16x64xf32>
    %327 = tpu.matmul %324, %326, %cst_137 {dimension_numbers = #tpu.dot_dimension_numbers<[1], [0], [0], [1], [0, 0, 1, 1], [], []>} : vector<16x32xf32>, vector<32x64xf32>, vector<16x64xf32> -> vector<16x64xf32>
    %c1_138 = arith.constant 1 : index
    %c0_139 = arith.constant 0 : index
    %c0_140 = arith.constant 0 : index
    %328 = vector.load %arg18[%c1_138, %c0_139, %c0_140] : memref<2x1x64xf32, #tpu.memory_space<vmem>>, vector<1x1x64xf32>
    %329 = vector.shape_cast %328 : vector<1x1x64xf32> to vector<1x64xf32>
    %330 = vector.broadcast %329 : vector<1x64xf32> to vector<16x64xf32>
    %331 = arith.addf %327, %330 : vector<16x64xf32>
    %cst_141 = arith.constant 5.000000e-01 : f32
    %332 = vector.broadcast %cst_141 : f32 to vector<16x64xf32>
    %333 = arith.mulf %332, %331 : vector<16x64xf32>
    %cst_142 = arith.constant 0.707106769 : f32
    %334 = vector.broadcast %cst_142 : f32 to vector<16x64xf32>
    %335 = arith.mulf %331, %334 : vector<16x64xf32>
    %cst_143 = arith.constant 0.000000e+00 : f32
    %336 = vector.broadcast %cst_143 : f32 to vector<16x64xf32>
    %337 = arith.cmpf oge, %335, %336 : vector<16x64xf32>
    %cst_144 = arith.constant 1.000000e+00 : f32
    %cst_145 = arith.constant -1.000000e+00 : f32
    %338 = vector.broadcast %cst_144 : f32 to vector<16x64xf32>
    %339 = vector.broadcast %cst_145 : f32 to vector<16x64xf32>
    %340 = arith.select %337, %338, %339 : vector<16x64xi1>, vector<16x64xf32>
    %341 = math.absf %335 : vector<16x64xf32>
    %cst_146 = arith.constant 0.327591091 : f32
    %342 = vector.broadcast %cst_146 : f32 to vector<16x64xf32>
    %343 = arith.mulf %342, %341 : vector<16x64xf32>
    %cst_147 = arith.constant 1.000000e+00 : f32
    %344 = vector.broadcast %cst_147 : f32 to vector<16x64xf32>
    %345 = arith.addf %344, %343 : vector<16x64xf32>
    %cst_148 = arith.constant 1.000000e+00 : f32
    %346 = vector.broadcast %cst_148 : f32 to vector<16x64xf32>
    %347 = arith.divf %346, %345 : vector<16x64xf32>
    %cst_149 = arith.constant 1.06140542 : f32
    %348 = vector.broadcast %cst_149 : f32 to vector<16x64xf32>
    %349 = arith.mulf %348, %347 : vector<16x64xf32>
    %cst_150 = arith.constant -1.45315206 : f32
    %350 = vector.broadcast %cst_150 : f32 to vector<16x64xf32>
    %351 = arith.addf %349, %350 : vector<16x64xf32>
    %352 = arith.mulf %351, %347 : vector<16x64xf32>
    %cst_151 = arith.constant 1.42141378 : f32
    %353 = vector.broadcast %cst_151 : f32 to vector<16x64xf32>
    %354 = arith.addf %352, %353 : vector<16x64xf32>
    %355 = arith.mulf %354, %347 : vector<16x64xf32>
    %cst_152 = arith.constant -0.284496725 : f32
    %356 = vector.broadcast %cst_152 : f32 to vector<16x64xf32>
    %357 = arith.addf %355, %356 : vector<16x64xf32>
    %358 = arith.mulf %357, %347 : vector<16x64xf32>
    %cst_153 = arith.constant 0.254829586 : f32
    %359 = vector.broadcast %cst_153 : f32 to vector<16x64xf32>
    %360 = arith.addf %358, %359 : vector<16x64xf32>
    %361 = arith.mulf %360, %347 : vector<16x64xf32>
    %cst_154 = arith.constant 0.000000e+00 : f32
    %362 = vector.broadcast %cst_154 : f32 to vector<16x64xf32>
    %363 = arith.subf %362, %341 : vector<16x64xf32>
    %364 = arith.mulf %363, %341 : vector<16x64xf32>
    %365 = math.exp %364 : vector<16x64xf32>
    %366 = arith.mulf %361, %365 : vector<16x64xf32>
    %cst_155 = arith.constant 1.000000e+00 : f32
    %367 = vector.broadcast %cst_155 : f32 to vector<16x64xf32>
    %368 = arith.subf %367, %366 : vector<16x64xf32>
    %369 = arith.mulf %340, %368 : vector<16x64xf32>
    %cst_156 = arith.constant 1.000000e+00 : f32
    %370 = vector.broadcast %cst_156 : f32 to vector<16x64xf32>
    %371 = arith.addf %370, %369 : vector<16x64xf32>
    %372 = arith.mulf %333, %371 : vector<16x64xf32>
    %c1_157 = arith.constant 1 : index
    %c0_158 = arith.constant 0 : index
    %c0_159 = arith.constant 0 : index
    %373 = vector.load %arg19[%c1_157, %c0_158, %c0_159] : memref<2x64x32xf32, #tpu.memory_space<vmem>>, vector<1x64x32xf32>
    %374 = vector.shape_cast %373 : vector<1x64x32xf32> to vector<64x32xf32>
    %cst_160 = arith.constant dense<0.000000e+00> : vector<16x32xf32>
    %375 = tpu.matmul %372, %374, %cst_160 {dimension_numbers = #tpu.dot_dimension_numbers<[1], [0], [0], [1], [0, 0, 1, 1], [], []>} : vector<16x64xf32>, vector<64x32xf32>, vector<16x32xf32> -> vector<16x32xf32>
    %c1_161 = arith.constant 1 : index
    %c0_162 = arith.constant 0 : index
    %c0_163 = arith.constant 0 : index
    %376 = vector.load %arg20[%c1_161, %c0_162, %c0_163] : memref<2x1x32xf32, #tpu.memory_space<vmem>>, vector<1x1x32xf32>
    %377 = vector.shape_cast %376 : vector<1x1x32xf32> to vector<1x32xf32>
    %378 = vector.broadcast %377 : vector<1x32xf32> to vector<16x32xf32>
    %379 = arith.addf %375, %378 : vector<16x32xf32>
    %380 = arith.addf %379, %324 : vector<16x32xf32>
    %c1_164 = arith.constant 1 : index
    %c0_165 = arith.constant 0 : index
    %c0_166 = arith.constant 0 : index
    %381 = vector.load %arg21[%c1_164, %c0_165, %c0_166] : memref<2x1x32xf32, #tpu.memory_space<vmem>>, vector<1x1x32xf32>
    %382 = vector.shape_cast %381 : vector<1x1x32xf32> to vector<1x32xf32>
    %c1_167 = arith.constant 1 : index
    %c0_168 = arith.constant 0 : index
    %c0_169 = arith.constant 0 : index
    %383 = vector.load %arg22[%c1_167, %c0_168, %c0_169] : memref<2x1x32xf32, #tpu.memory_space<vmem>>, vector<1x1x32xf32>
    %384 = vector.shape_cast %383 : vector<1x1x32xf32> to vector<1x32xf32>
    %cst_170 = arith.constant dense<0.000000e+00> : vector<16xf32>
    %385 = vector.multi_reduction <add>, %380, %cst_170 [1] : vector<16x32xf32> to vector<16xf32>
    %386 = vector.shape_cast %385 : vector<16xf32> to vector<16x1xf32>
    %cst_171 = arith.constant 3.200000e+01 : f32
    %387 = vector.broadcast %cst_171 : f32 to vector<16x1xf32>
    %388 = arith.divf %386, %387 : vector<16x1xf32>
    %389 = vector.broadcast %388 : vector<16x1xf32> to vector<16x32xf32>
    %390 = arith.subf %380, %389 : vector<16x32xf32>
    %391 = arith.mulf %390, %390 : vector<16x32xf32>
    %cst_172 = arith.constant dense<0.000000e+00> : vector<16xf32>
    %392 = vector.multi_reduction <add>, %391, %cst_172 [1] : vector<16x32xf32> to vector<16xf32>
    %393 = vector.shape_cast %392 : vector<16xf32> to vector<16x1xf32>
    %cst_173 = arith.constant 3.200000e+01 : f32
    %394 = vector.broadcast %cst_173 : f32 to vector<16x1xf32>
    %395 = arith.divf %393, %394 : vector<16x1xf32>
    %396 = vector.broadcast %388 : vector<16x1xf32> to vector<16x32xf32>
    %397 = arith.subf %380, %396 : vector<16x32xf32>
    %cst_174 = arith.constant 9.99999974E-6 : f32
    %398 = vector.broadcast %cst_174 : f32 to vector<16x1xf32>
    %399 = arith.addf %395, %398 : vector<16x1xf32>
    %400 = math.rsqrt %399 : vector<16x1xf32>
    %401 = vector.broadcast %400 : vector<16x1xf32> to vector<16x32xf32>
    %402 = arith.mulf %397, %401 : vector<16x32xf32>
    %403 = vector.broadcast %382 : vector<1x32xf32> to vector<16x32xf32>
    %404 = arith.mulf %402, %403 : vector<16x32xf32>
    %405 = vector.broadcast %384 : vector<1x32xf32> to vector<16x32xf32>
    %406 = arith.addf %404, %405 : vector<16x32xf32>
    %407 = vector.shape_cast %406 : vector<16x32xf32> to vector<2x8x32xf32>
    %408 = vector.extract_strided_slice %407 {offsets = [0, 0, 0], sizes = [2, 1, 32], strides = [1, 1, 1]} : vector<2x8x32xf32> to vector<2x1x32xf32>
    %409 = vector.shape_cast %408 : vector<2x1x32xf32> to vector<2x32xf32>
    %c0_175 = arith.constant 0 : index
    %c0_176 = arith.constant 0 : index
    %410 = vector.load %arg23[%c0_175, %c0_176] : memref<32x2xf32, #tpu.memory_space<vmem>>, vector<32x2xf32>
    %cst_177 = arith.constant dense<0.000000e+00> : vector<2x2xf32>
    %411 = tpu.matmul %409, %410, %cst_177 {dimension_numbers = #tpu.dot_dimension_numbers<[1], [0], [0], [1], [0, 0, 1, 1], [], []>} : vector<2x32xf32>, vector<32x2xf32>, vector<2x2xf32> -> vector<2x2xf32>
    %c0_178 = arith.constant 0 : index
    %c0_179 = arith.constant 0 : index
    %412 = vector.load %arg24[%c0_178, %c0_179] : memref<1x2xf32, #tpu.memory_space<vmem>>, vector<1x2xf32>
    %413 = vector.broadcast %412 : vector<1x2xf32> to vector<2x2xf32>
    %414 = arith.addf %411, %413 : vector<2x2xf32>
    %c0_180 = arith.constant 0 : index
    %c0_181 = arith.constant 0 : index
    %415 = vector.load %arg25[%c0_180, %c0_181] : memref<2x2xf32, #tpu.memory_space<vmem>>, vector<2x2xf32>
    tpu.vector_store %arg25[%c0_180, %c0_181], %414 {strides = array<i32>} : memref<2x2xf32, #tpu.memory_space<vmem>>, vector<2x2xf32>,
    return
  }
}

</mosaic_0001>

<bundles_post_ra>
// kernel: model_forward.1
= control target key start
LH: loop header
LB: loop body
LE: loop exit
PB: predicated region body
PF: predicated region fallthrough
CT: control target
= control target key end

     0   :  { %s4597_s0 = inlined_call_operand.vmem [shape: f32[16,16], index: 0, kind: input, shape index: {}]   ;;  %s4598_s1 = inlined_call_operand.vmem [shape: f32[16,16], index: 1, kind: input, shape index: {}]   ;;  %s4599_s2 = inlined_call_operand.vmem [shape: f32[16,1], index: 2, kind: input, shape index: {}]   ;;  %s4600_s3 = inlined_call_operand.vmem [shape: f32[1,16], index: 3, kind: input, shape index: {}]   ;;  %s4601_s4 = inlined_call_operand.vmem [shape: f32[16,1], index: 4, kind: input, shape index: {}]   ;;  %s4602_s5 = inlined_call_operand.vmem [shape: f32[1,16], index: 5, kind: input, shape index: {}]   ;;  %s4603_s6 = inlined_call_operand.vmem [shape: f32[2,4,16,16], index: 6, kind: input, shape index: {}]   ;;  %s4604_s7 = inlined_call_operand.vmem [shape: f32[1,16], index: 7, kind: input, shape index: {}]   ;;  %s4605_s8 = inlined_call_operand.vmem [shape: f32[1,16], index: 8, kind: input, shape index: {}]   ;;  %s4606_s9 = inlined_call_operand.vmem [shape: f32[16,32], index: 9, kind: input, shape index: {}]   ;;  %s4607_s10 = inlined_call_operand.vmem [shape: f32[1,32], index: 10, kind: input, shape index: {}]   ;;  %s4608_s11 = inlined_call_operand.vmem [shape: f32[2,32,96], index: 11, kind: input, shape index: {}]   ;;  %s4609_s12 = inlined_call_operand.vmem [shape: f32[2,1,96], index: 12, kind: input, shape index: {}]   ;;  %s4610_s13 = inlined_call_operand.vmem [shape: f32[2,32,32], index: 13, kind: input, shape index: {}]   ;;  %s4611_s14 = inlined_call_operand.vmem [shape: f32[2,1,32], index: 14, kind: input, shape index: {}]   ;;  %s4612_s15 = inlined_call_operand.vmem [shape: f32[2,1,32], index: 15, kind: input, shape index: {}]   ;;  %s4613_s16 = inlined_call_operand.vmem [shape: f32[2,1,32], index: 16, kind: input, shape index: {}]   ;;  %s4614_s17 = inlined_call_operand.vmem [shape: f32[2,32,64], index: 17, kind: input, shape index: {}]   ;;  %s4615_s18 = inlined_call_operand.vmem [shape: f32[2,1,64], index: 18, kind: input, shape index: {}]   ;;  %s4616_s19 = inlined_call_operand.vmem [shape: f32[2,64,32], index: 19, kind: input, shape index: {}]   ;;  %s4617_s20 = inlined_call_operand.vmem [shape: f32[2,1,32], index: 20, kind: input, shape index: {}]   ;;  %s4618_s21 = inlined_call_operand.vmem [shape: f32[2,1,32], index: 21, kind: input, shape index: {}]   ;;  %s4619_s22 = inlined_call_operand.vmem [shape: f32[2,1,32], index: 22, kind: input, shape index: {}]   ;;  %s4620_s23 = inlined_call_operand.vmem [shape: f32[32,2], index: 23, kind: input, shape index: {}]   ;;  %s4621_s24 = inlined_call_operand.vmem [shape: f32[1,2], index: 24, kind: input, shape index: {}]   ;;  %s4622_s25 = inlined_call_operand.hbm [shape: f32[2,2], index: 25, kind: output, shape index: {}]  }
   0x1   :  { %4632 = sst [smem:[#allocation5_spill]] %s4597_s0 }
   0x2   :  { %4633 = sst [smem:[#allocation6_spill]] %s4598_s1 }
   0x3   :  { %4634 = sst [smem:[#allocation7_spill]] %s4599_s2 }
   0x4   :  { %4635 = sst [smem:[#allocation8_spill]] %s4600_s3 }
   0x5   :  { %4636 = sst [smem:[#allocation9_spill]] %s4601_s4 }
   0x6   :  { %4637 = sst [smem:[#allocation10_spill]] %s4602_s5 }
   0x7   :  { %4638 = sst [smem:[#allocation11_spill]] %s4603_s6 }
   0x8   :  { %4639 = sst [smem:[#allocation12_spill]] %s4604_s7 }
   0x9   :  { %4640 = sst [smem:[#allocation13_spill]] %s4605_s8 }
   0xa   :  { %4641 = sst [smem:[#allocation14_spill]] %s4606_s9 }
   0xb   :  { %4642 = sst [smem:[#allocation15_spill]] %s4617_s20 }
   0xc   :  { %s4643_s6 = sld [smem:[#allocation5_spill]]  ;;  %vm133_vm0 = vcmask 130048  }
   0xd   :  { %s4644_s20 = sld [smem:[#allocation6_spill]] }
  0x12   :  { %v125_v0 = vld [vmem:[%s4643_s6] sm:$0xff]  ;;  %v126_v2 = vld [vmem:[%s4643_s6 + $0x8] sm:$0xff] }
  0x13   :  { %v127_v1 = vld [vmem:[%s4644_s20] sm:$0xff]  ;;  %v128_v4 = vld [vmem:[%s4644_s20 + $0x8] sm:$0xff] }
  0x14   :  { %v129_v3 = vadd.f32 %v127_v1, %v125_v0 }
  0x15   :  { %30 = vsyncpa [#allocation3], 0  ;;  %v130_v5 = vadd.f32 %v128_v4, %v126_v2  ;;  %s4645_s4 = sld [smem:[#allocation14_spill]]  ;;  %v270_v20 = vld [vmem:[%s4608_s11 + $0x18] sm:$0xff]  ;;  %v269_v37 = vld [vmem:[%s4608_s11 + $0x10] sm:$0xff]  ;;  %vm278_vm1 = vcmask 261120  }
  0x16   :  { %v134_v6 = vsel %vm133_vm0, %v129_v3, 0.0  ;;  %3390 = vmatprep.subr.mxu1 %v270_v20  ;;  %s4646_s6 = sld [smem:[#allocation12_spill]]  ;;  %v268_v38 = vld [vmem:[%s4608_s11 + $0x8] sm:$0xff]  ;;  %v267_v39 = vld [vmem:[%s4608_s11] sm:$0xff]  ;;  %vm386_vm2 = vcmask 64512   ;;  %s3756_s29 = smov 120  }
  0x17   :  { %135 = vadd.xlane.f32.xlu0 %v134_v6  ;;  %v137_v7 = vsel %vm133_vm0, %v130_v5, 0.0  ;;  %3391 = vmatpush3.msra.mxu1 %v270_v20  ;;  %s4647_s3 = sld [smem:[#allocation13_spill]]  ;;  %v3133_v41 = vld [vmem:[%s4607_s10] ss:$0 sm:$0xff]  ;;  %s3755_s10 = smov 112   ;;  %v3757_v50 = vmov 0  }
  0x18   :  { %3392 = vmatprep.subr.mxu1 %v269_v37  ;;  %v3136_v45 = vld [vmem:[%s4609_s12] ss:$0 sm:$0xff]  ;;  %3632 = vset.pattern.permute.xlu1 %v3757_v50  ;;  %s3758_s2 = smov 96   ;;  %s4649_s27 = sld [smem:[#allocation10_spill]]  ;;  %vm1211_vm5 = vcmask 195584   ;;  %vm1514_vm8 = vcmask 523264  }
  0x19   :  { %3393 = vmatpush3.msra.mxu1 %v269_v37  ;;  %3631 = vset.pattern.permute.xlu0 %v3757_v50  ;;  %s4650_s9 = sld [smem:[#allocation11_spill]]  ;;  %s3761_s26 = smov 64   ;;  %vm3767_vm11 = vmmov 0   ;;  %vm3039_vm12 = vcmask 1041409   ;;  %vm3113_vm13 = vcmask 9216  }
  0x1a   :  { %3394 = vmatprep.subr.mxu1 %v268_v38  ;;  %s3762_s20 = smov 8   ;;  %s4653_s0 = sld [smem:[#allocation15_spill]] }
  0x1b   :  { %138 = vadd.xlane.f32.xlu0 %v137_v7  ;;  %v178_v18 = vld [vmem:[%s4645_s4 + $0x8] sm:$0xff]  ;;  %v177_v19 = vld [vmem:[%s4645_s4] sm:$0xff]  ;;  %3395 = vmatpush3.msra.mxu1 %v268_v38  ;;  %s4652_s4 = sld [smem:[#allocation8_spill]]  ;;  %s4654_s30 = smov 24  }
  0x1c   :  { %3383 = vmatprep.subr.mxu0 %v178_v18  ;;  %v3131_v28 = vld [vmem:[%s4646_s6] ss:$0 sm:$0xff]  ;;  %3396 = vmatprep.subr.mxu1 %v267_v39  ;;  %s3759_s6 = smov 104  }
  0x1d   :  { %3384 = vmatpush3.msra.mxu0 %v178_v18  ;;  %v3132_v30 = vld [vmem:[%s4647_s3] ss:$0 sm:$0xff]  ;;  %3397 = vmatpush3.msra.mxu1 %v267_v39  ;;  %s4648_s3 = sld [smem:[#allocation9_spill]] }
  0x1e   :  { %3385 = vmatprep.subr.mxu0 %v177_v19 }
  0x1f   :  { %3386 = vmatpush3.msra.mxu0 %v177_v19  ;;  %v375_v6 = vld [vmem:[%s4650_s9 + $0x8] sm:$0xff]  ;;  %v377_v19 = vld [vmem:[%s4650_s9 + $0x18] sm:$0xff]  ;;  %v380_v38 = vld [vmem:[%s4650_s9 + $0x30] sm:$0xff] }
  0x23   :  { %v102_v55 = vld [vmem:[%s4648_s3] sm:$0xff]  ;;  %v103_v60 = vld [vmem:[%s4648_s3 + $0x8] sm:$0xff]  ;;  %s4651_s3 = sld [smem:[#allocation7_spill]] }
  0xa0   :  { %v136_v8 = vpop.xlane.xlu0 %135 }
  0xa1   :  { %v141_v9 = vmul.f32 0.0625, %v136_v8  ;;  %v3760_v8 = vmov -1e+30  }
  0xa3   :  { %v143_v10 = vsub.f32 %v129_v3, %v141_v9  ;;  %v3130_v3 = vld [vmem:[%s4649_s27] ss:$0 sm:$0xff]  ;;  %s3763_s27 = smov 16  }
  0xa4   :  { %v139_v11 = vpop.xlane.xlu0 %138 }
  0xa5   :  { %v142_v12 = vmul.f32 0.0625, %v139_v11  ;;  %v145_v13 = vmul.f32 %v143_v10, %v143_v10 }
  0xa7   :  { %v144_v14 = vsub.f32 %v130_v5, %v142_v12  ;;  %v147_v15 = vsel %vm133_vm0, %v145_v13, 0.0 }
  0xa8   :  { %148 = vadd.xlane.f32.xlu1 %v147_v15 }
  0xa9   :  { %v146_v16 = vmul.f32 %v144_v14, %v144_v14 }
  0xab   :  { %v150_v17 = vsel %vm133_vm0, %v146_v16, 0.0 }
  0xac   :  { %151 = vadd.xlane.f32.xlu1 %v150_v17 }
 0x131   :  { %v149_v21 = vpop.xlane.xlu1 %148 }
 0x132   :  { %v153_v22 = vmul.f32 0.0625, %v149_v21  ;;  %v378_v21 = vld [vmem:[%s4650_s9 + $0x20] sm:$0xff] }
 0x134   :  { %v155_v23 = vadd.f32 1e-05, %v153_v22 }
 0x135   :  { %v152_v24 = vpop.xlane.xlu1 %151 }
 0x136   :  { %3633 = vrsqrt.f32 %v155_v23  ;;  %v154_v25 = vmul.f32 0.0625, %v152_v24  ;;  %v376_v23 = vld [vmem:[%s4650_s9 + $0x10] sm:$0xff] }
 0x138   :  { %v156_v26 = vadd.f32 1e-05, %v154_v25 }
 0x13a   :  { %3635 = vrsqrt.f32 %v156_v26  ;;  %v379_v26 = vld [vmem:[%s4650_s9 + $0x28] sm:$0xff] }
 0x143   :  { %v3634_v27 = vpop.eup %3633 }
 0x144   :  { %v159_v29 = vmul.f32 %v3634_v27, %v143_v10  ;;  %v374_v10 = vld [vmem:[%s4650_s9] sm:$0xff] }
 0x146   :  { %v167_v31 = vmul.f32 %v3131_v28, %v159_v29 }
 0x147   :  { %v3636_v32 = vpop.eup %3635 }
 0x148   :  { %v160_v33 = vmul.f32 %v3636_v32, %v144_v14  ;;  %v175_v34 = vadd.f32 %v3132_v30, %v167_v31 }
 0x14a   :  { %v168_v35 = vmul.f32 %v3131_v28, %v160_v33  ;;  %3387 = vmatprep.mubr.msk.f32.mxu0 %vm133_vm0, %v175_v34 }
 0x14c   :  { %v176_v36 = vadd.f32 %v3132_v30, %v168_v35  ;;  %v381_v35 = vld [vmem:[%s4650_s9 + $0x38] sm:$0xff] }
 0x14e   :  { %3388 = vmatmul.mubr.msk.f32.vlgmr.msra.gmra.mxu0 %vm133_vm0, %v176_v36 }
 0x20e   :  { %v3389_v40 = vpop.f32.mrf.mxu0 }
 0x20f   :  { %v3946_v44 = vadd.f32 %v3389_v40, %v3133_v41 }
 0x210   :  { %v258_v42 = vpop.f32.mrf.mxu0 }
 0x211   :  { %v3944_v43 = vadd.f32 %v3133_v41, %v258_v42 }
 0x213   :  { %3398 = vmatprep.mubr.msk.f32.mxu1 %vm278_vm1, %v3944_v43 }
 0x214   :  { %3399 = vmatmul.mubr.msk.f32.vlgmr.msra.gmra.mxu1 %vm278_vm1, %v3946_v44 }
 0x2d4   :  { %v3400_v46 = vpop.f32.mrf.mxu1 }
 0x2d5   :  { %v3955_v47 = vadd.f32 %v3400_v46, %v3136_v45 }
 0x2d6   :  { %v351_v48 = vpop.f32.mrf.mxu1 }
 0x2d7   :  { %v3957_v49 = vadd.f32 %v3136_v45, %v351_v48  ;;  %368 = vrot.lane.b32.xlu1 %v3955_v47, %s3755_s10  ;;  %364 = vrot.lane.b32.xlu0 %v3955_v47, %s3756_s29 }
 0x2d9   :  { %3405 = vmatprep.mubr.msk.f32.mxu0 %vm386_vm2, %v3957_v49 }
 0x2db   :  { %366 = vrot.lane.b32.xlu0 %v3957_v49, %s3755_s10  ;;  %362 = vrot.lane.b32.xlu1 %v3957_v49, %s3756_s29 }
 0x2df   :  { %384 = vrot.lane.b32.xlu0 %v3955_v47, %s3758_s2  ;;  %372 = vrot.lane.b32.xlu1 %v3955_v47, %s3759_s6 }
 0x2e3   :  { %382 = vrot.lane.b32.xlu0 %v3957_v49, %s3758_s2  ;;  %370 = vrot.lane.b32.xlu1 %v3957_v49, %s3759_s6 }
 0x349   :  { %v3977_v51 = vpop.permute.xlu1 %368  ;;  %v3979_v52 = vpop.permute.xlu0 %364 }
 0x34a   :  { %559 = vrot.lane.b32.xlu0 %v3977_v51, %s3758_s2  ;;  %472 = vrot.lane.b32.xlu1 %v3979_v52, %s3758_s2 }
 0x34d   :  { %v3985_v53 = vpop.permute.xlu0 %366  ;;  %v3987_v54 = vpop.permute.xlu1 %362 }
 0x34e   :  { %557 = vrot.lane.b32.xlu0 %v3985_v53, %s3758_s2  ;;  %3412 = vmatprep.mubr.msk.f32.mxu1 %vm386_vm2, %v3987_v54 }
 0x34f   :  { %470 = vrot.lane.b32.xlu1 %v3987_v54, %s3758_s2 }
 0x351   :  { %v385_v56 = vpop.permute.xlu0 %384  ;;  %v3998_v57 = vpop.permute.xlu1 %372 }
 0x352   :  { %3401 = vmatprep.subr.msk.mxu0 %vm386_vm2, %v385_v56  ;;  %107 = vperm.xlu0 %3631, %v102_v55  }
 0x353   :  { %646 = vrot.lane.b32.xlu1 %v3998_v57, %s3758_s2  ;;  %3402 = vmatpush3.xpose.msk.msra.mxu0 %vm386_vm2, %v385_v56 }
 0x355   :  { %v383_v58 = vpop.permute.xlu0 %382  ;;  %v4004_v59 = vpop.permute.xlu1 %370 }
 0x356   :  { %3403 = vmatprep.subr.msk.mxu0 %vm386_vm2, %v383_v58 }
 0x357   :  { %644 = vrot.lane.b32.xlu1 %v4004_v59, %s3758_s2  ;;  %3404 = vmatpush3.xpose.msk.msra.mxu0 %vm386_vm2, %v383_v58  ;;  %v81_v58 = vld [vmem:[%s4651_s3] sm:$0xff] }
 0x35a   :  { %3406 = vmatmul.mubr.msk.f32.vlgmr.msra.gmra.mxu0 %vm386_vm2, %v3955_v47 }
 0x35b   :  { %3419 = vmatprep.mubr.msk.f32.mxu0 %vm386_vm2, %v3985_v53  ;;  %112 = vperm.xlu1 %3632, %v103_v60   ;;  %v82_v60 = vld [vmem:[%s4651_s3 + $0x8] sm:$0xff] }
 0x3bc   :  { %v560_v61 = vpop.permute.xlu0 %559  ;;  %v473_v62 = vpop.permute.xlu1 %472 }
 0x3bd   :  { %3408 = vmatprep.subr.msk.mxu1 %vm386_vm2, %v473_v62  ;;  %3415 = vmatprep.subr.msk.mxu0 %vm386_vm2, %v560_v61 }
 0x3be   :  { %3409 = vmatpush3.xpose.msk.msra.mxu1 %vm386_vm2, %v473_v62  ;;  %3416 = vmatpush3.xpose.msk.msra.mxu0 %vm386_vm2, %v560_v61 }
 0x3c0   :  { %v558_v63 = vpop.permute.xlu0 %557 }
 0x3c1   :  { %v471_v0 = vpop.permute.xlu1 %470  ;;  %3417 = vmatprep.subr.msk.mxu0 %vm386_vm2, %v558_v63 }
 0x3c2   :  { %3410 = vmatprep.subr.msk.mxu1 %vm386_vm2, %v471_v0  ;;  %3418 = vmatpush3.xpose.msk.msra.mxu0 %vm386_vm2, %v558_v63 }
 0x3c3   :  { %3411 = vmatpush3.xpose.msk.msra.mxu1 %vm386_vm2, %v471_v0 }
 0x3c5   :  { %v647_v1 = vpop.permute.xlu1 %646  ;;  %3420 = vmatmul.mubr.msk.f32.vlgmr.msra.gmra.mxu0 %vm386_vm2, %v3977_v51 }
 0x3c6   :  { %3413 = vmatmul.mubr.msk.f32.vlgmr.msra.gmra.mxu1 %vm386_vm2, %v3979_v52  ;;  %3422 = vmatprep.subr.msk.mxu1 %vm386_vm2, %v647_v1 }
 0x3c7   :  { %3423 = vmatpush3.xpose.msk.msra.mxu1 %vm386_vm2, %v647_v1  ;;  %3426 = vmatprep.mubr.msk.f32.mxu1 %vm386_vm2, %v4004_v59 }
 0x3c9   :  { %v645_v2 = vpop.permute.xlu1 %644 }
 0x3ca   :  { %3424 = vmatprep.subr.msk.mxu1 %vm386_vm2, %v645_v2 }
 0x3cb   :  { %3425 = vmatpush3.xpose.msk.msra.mxu1 %vm386_vm2, %v645_v2 }
 0x3cd   :  { %v108_v5 = vpop.permute.xlu0 %107 }
 0x3ce   :  { %3427 = vmatmul.mubr.msk.f32.vlgmr.msra.gmra.mxu1 %vm386_vm2, %v3998_v57  ;;  %vm121_vm4 = vcmp.eq.f32.partialorder %v108_v5, %v3130_v3 }
 0x3cf   :  { %v4048_v13 = vsel %vm121_vm4, 0.0, %v3760_v8 }
 0x3d6   :  { %v113_v4 = vpop.permute.xlu1 %112 }
 0x3d7   :  { %vm122_vm3 = vcmp.eq.f32.partialorder %v113_v4, %v3130_v3 }
 0x3d8   :  { %v4043_v9 = vsel %vm122_vm3, 0.0, %v3760_v8 }
 0x41a   :  { %v3407_v7 = vpop.f32.mrf.mxu0 }
 0x41b   :  { %v467_v11 = vadd.f32 %v3407_v7, %v375_v6 }
 0x41c   :  { %v461_v12 = vpop.f32.mrf.mxu0 }
 0x41d   :  { %v462_v14 = vadd.f32 %v461_v12, %v374_v10  ;;  %v732_v15 = vadd.f32 %v467_v11, %v4043_v9 }
 0x41f   :  { %v742_v16 = vsel %vm133_vm0, %v732_v15, -inf  ;;  %v731_v17 = vadd.f32 %v462_v14, %v4048_v13 }
 0x420   :  { %743 = vmax.xlane.f32.xlu0 %v742_v16 }
 0x421   :  { %v739_v18 = vsel %vm133_vm0, %v731_v17, -inf }
 0x422   :  { %740 = vmax.xlane.f32.xlu1 %v739_v18 }
 0x485   :  { %v3421_v20 = vpop.f32.mrf.mxu0 }
 0x486   :  { %v3414_v22 = vpop.f32.mrf.mxu1  ;;  %v641_v32 = vadd.f32 %v3421_v20, %v379_v26 }
 0x487   :  { %v554_v24 = vadd.f32 %v3414_v22, %v377_v19  ;;  %v635_v25 = vpop.f32.mrf.mxu0 }
 0x488   :  { %v548_v27 = vpop.f32.mrf.mxu1  ;;  %v636_v28 = vadd.f32 %v635_v25, %v378_v21  ;;  %v736_v41 = vadd.f32 %v641_v32, %v4043_v9 }
 0x489   :  { %v549_v29 = vadd.f32 %v548_v27, %v376_v23  ;;  %v734_v30 = vadd.f32 %v554_v24, %v4043_v9 }
 0x48a   :  { %v735_v31 = vadd.f32 %v636_v28, %v4048_v13  ;;  %v754_v46 = vsel %vm133_vm0, %v736_v41, -inf }
 0x48b   :  { %v748_v33 = vsel %vm133_vm0, %v734_v30, -inf  ;;  %v733_v34 = vadd.f32 %v549_v29, %v4048_v13 }
 0x48c   :  { %749 = vmax.xlane.f32.xlu0 %v748_v33  ;;  %v751_v36 = vsel %vm133_vm0, %v735_v31, -inf }
 0x48d   :  { %752 = vmax.xlane.f32.xlu1 %v751_v36  ;;  %v745_v40 = vsel %vm133_vm0, %v733_v34, -inf }
 0x48e   :  { %v3428_v37 = vpop.f32.mrf.mxu1 }
 0x48f   :  { %v728_v39 = vadd.f32 %v3428_v37, %v381_v35 }
 0x490   :  { %v722_v42 = vpop.f32.mrf.mxu1  ;;  %746 = vmax.xlane.f32.xlu0 %v745_v40 }
 0x491   :  { %v723_v45 = vadd.f32 %v722_v42, %v380_v38  ;;  %v738_v50 = vadd.f32 %v728_v39, %v4043_v9 }
 0x493   :  { %v737_v48 = vadd.f32 %v723_v45, %v4048_v13  ;;  %v760_v56 = vsel %vm133_vm0, %v738_v50, -inf }
 0x494   :  { %755 = vmax.xlane.f32.xlu0 %v754_v46  ;;  %v3129_v46 = vld [vmem:[%s4652_s4] ss:$0 sm:$0xff]  ;;  %s4630_s4 = smov 24  }
 0x495   :  { %v757_v55 = vsel %vm133_vm0, %v737_v48, -inf }
 0x496   :  { %758 = vmax.xlane.f32.xlu1 %v757_v55 }
 0x498   :  { %761 = vmax.xlane.f32.xlu0 %v760_v56 }
 0x4a7   :  { %86 = vperm.xlu1 %3632, %v81_v58  }
 0x4ab   :  { %837 = vrot.lane.b32.xlu1 %v3955_v47, %s3761_s26  ;;  %v744_v47 = vpop.xlane.xlu0 %743  ;;  %v741_v62 = vpop.xlane.xlu1 %740 }
 0x4ac   :  { %v764_v61 = vsub.f32 %v732_v15, %v744_v47  ;;  %v763_v0 = vsub.f32 %v731_v17, %v741_v62 }
 0x4ae   :  { %91 = vperm.xlu0 %3631, %v82_v60   ;;  %v773_v63 = vmul.f32 1.442695, %v764_v61  ;;  %v771_v1 = vmul.f32 1.442695, %v763_v0 }
 0x4af   :  { %835 = vrot.lane.b32.xlu1 %v3957_v49, %s3761_s26 }
 0x4b0   :  { %3637 = vpow2.f32 %v773_v63 }
 0x4b1   :  { %3639 = vpow2.f32 %v771_v1 }
 0x4b2   :  { %922 = vrot.lane.b32.xlu0 %v3987_v54, %s3761_s26 }
 0x4b3   :  { %924 = vrot.lane.b32.xlu1 %v3979_v52, %s3761_s26 }
 0x4b6   :  { %1098 = vrot.lane.b32.xlu0 %v3998_v57, %s3761_s26 }
 0x4b7   :  { %1011 = vrot.lane.b32.xlu1 %v3977_v51, %s3761_s26 }
 0x4bd   :  { %v4102_v49 = vpop.eup %3637 }
 0x4be   :  { %v790_v54 = vsel %vm133_vm0, %v4102_v49, 0.0  ;;  %v4106_v52 = vpop.eup %3639 }
 0x4bf   :  { %v787_v57 = vsel %vm133_vm0, %v4106_v52, 0.0 }
 0x4d5   :  { %791 = vadd.xlane.f32.xlu0 %v790_v54 }
 0x4db   :  { %788 = vadd.xlane.f32.xlu1 %v787_v57 }
 0x515   :  { %v750_v51 = vpop.xlane.xlu0 %749 }
 0x516   :  { %v766_v2 = vsub.f32 %v734_v30, %v750_v51  ;;  %v753_v3 = vpop.xlane.xlu1 %752 }
 0x517   :  { %v767_v5 = vsub.f32 %v735_v31, %v753_v3 }
 0x518   :  { %v777_v4 = vmul.f32 1.442695, %v766_v2 }
 0x519   :  { %v747_v6 = vpop.xlane.xlu0 %746  ;;  %v779_v8 = vmul.f32 1.442695, %v767_v5 }
 0x51a   :  { %3641 = vpow2.f32 %v777_v4  ;;  %v765_v7 = vsub.f32 %v733_v34, %v747_v6 }
 0x51c   :  { %v775_v10 = vmul.f32 1.442695, %v765_v7 }
 0x51d   :  { %v756_v11 = vpop.xlane.xlu0 %755 }
 0x51e   :  { %3643 = vpow2.f32 %v775_v10  ;;  %v768_v12 = vsub.f32 %v736_v41, %v756_v11 }
 0x51f   :  { %v759_v14 = vpop.xlane.xlu1 %758  ;;  %3645 = vpow2.f32 %v779_v8 }
 0x520   :  { %v781_v15 = vmul.f32 1.442695, %v768_v12  ;;  %v769_v16 = vsub.f32 %v737_v48, %v759_v14 }
 0x521   :  { %v762_v17 = vpop.xlane.xlu0 %761 }
 0x522   :  { %3647 = vpow2.f32 %v781_v15  ;;  %v783_v18 = vmul.f32 1.442695, %v769_v16  ;;  %v770_v19 = vsub.f32 %v738_v50, %v762_v17 }
 0x523   :  { %v87_v20 = vpop.permute.xlu1 %86 }
 0x524   :  { %3649 = vpow2.f32 %v783_v18  ;;  %v785_v21 = vmul.f32 1.442695, %v770_v19  ;;  %v4142_v55 = vmul.f32 %v3129_v46, %v87_v20  ;;  %v1217_v18 = vld [vmem:[%s4610_s13 + $0x18] sm:$0xff]  ;;  %v1216_v20 = vld [vmem:[%s4610_s13 + $0x10] sm:$0xff] }
 0x526   :  { %3651 = vpow2.f32 %v785_v21  ;;  %v1215_v21 = vld [vmem:[%s4610_s13 + $0x8] sm:$0xff] }
 0x527   :  { %v4110_v22 = vpop.eup %3641  ;;  %v838_v23 = vpop.permute.xlu1 %837 }
 0x528   :  { %3429 = vmatprep.subr.mxu0 %v838_v23  ;;  %v796_v24 = vsel %vm133_vm0, %v4110_v22, 0.0 }
 0x529   :  { %797 = vadd.xlane.f32.xlu0 %v796_v24  ;;  %3430 = vmatpush3.msra.mxu0 %v838_v23  ;;  %v92_v38 = vpop.permute.xlu0 %91  ;;  %v1214_v23 = vld [vmem:[%s4610_s13] sm:$0xff] }
 0x52b   :  { %v4114_v25 = vpop.eup %3643  ;;  %v836_v26 = vpop.permute.xlu1 %835 }
 0x52c   :  { %3431 = vmatprep.subr.mxu0 %v836_v26  ;;  %v793_v27 = vsel %vm133_vm0, %v4114_v25, 0.0  ;;  %v4118_v28 = vpop.eup %3645 }
 0x52d   :  { %794 = vadd.xlane.f32.xlu1 %v793_v27  ;;  %3432 = vmatpush3.msra.mxu0 %v836_v26  ;;  %v799_v32 = vsel %vm133_vm0, %v4118_v28, 0.0  ;;  %v923_v39 = vpop.permute.xlu0 %922 }
 0x52f   :  { %v4120_v29 = vpop.eup %3647  ;;  %v925_v30 = vpop.permute.xlu1 %924 }
 0x530   :  { %3436 = vmatprep.subr.mxu0 %v925_v30  ;;  %v802_v31 = vsel %vm133_vm0, %v4120_v29, 0.0 }
 0x531   :  { %v4126_v33 = vpop.eup %3649  ;;  %803 = vadd.xlane.f32.xlu0 %v802_v31  ;;  %800 = vadd.xlane.f32.xlu1 %v799_v32  ;;  %v1099_v40 = vpop.permute.xlu0 %1098 }
 0x532   :  { %v805_v37 = vsel %vm133_vm0, %v4126_v33, 0.0 }
 0x533   :  { %v4128_v34 = vpop.eup %3651  ;;  %v1012_v35 = vpop.permute.xlu1 %1011 }
 0x534   :  { %3443 = vmatprep.subr.mxu1 %v1012_v35  ;;  %v808_v36 = vsel %vm133_vm0, %v4128_v34, 0.0 }
 0x535   :  { %809 = vadd.xlane.f32.xlu0 %v808_v36  ;;  %806 = vadd.xlane.f32.xlu1 %v805_v37 }
 0x536   :  { %3444 = vmatpush3.msra.mxu1 %v1012_v35 }
 0x546   :  { %1009 = vrot.lane.b32.xlu1 %v3985_v53, %s3761_s26 }
 0x54b   :  { %1096 = vrot.lane.b32.xlu0 %v4004_v59, %s3761_s26  ;;  %v4145_v59 = vmul.f32 %v3129_v46, %v92_v38 }
 0x55e   :  { %v792_v41 = vpop.xlane.xlu0 %791 }
 0x55f   :  { %3653 = vrcp.f32 %v792_v41 }
 0x564   :  { %v789_v42 = vpop.xlane.xlu1 %788 }
 0x565   :  { %3655 = vrcp.f32 %v789_v42  ;;  %v3163_v42 = vld [vmem:[%s4611_s14] ss:$0 sm:$0xff] }
 0x56c   :  { %v3654_v45 = vpop.eup %3653 }
 0x56d   :  { %v814_v50 = vmul.f32 %v3654_v45, %v4102_v49 }
 0x56f   :  { %v828_v58 = vmul.f32 %v814_v50, %v4145_v59 }
 0x572   :  { %v3656_v48 = vpop.eup %3655 }
 0x573   :  { %v812_v53 = vmul.f32 %v3656_v48, %v4106_v52 }
 0x575   :  { %v827_v56 = vmul.f32 %v812_v53, %v4142_v55 }
 0x577   :  { %3433 = vmatprep.mubr.msk.f32.mxu0 %vm133_vm0, %v827_v56 }
 0x578   :  { %3434 = vmatmul.mubr.msk.f32.vlgmr.msra.gmra.mxu0 %vm133_vm0, %v828_v58 }
 0x579   :  { %3437 = vmatpush3.msra.mxu0 %v925_v30 }
 0x57a   :  { %3438 = vmatprep.subr.mxu0 %v923_v39 }
 0x57b   :  { %3439 = vmatpush3.msra.mxu0 %v923_v39 }
 0x57c   :  { %3450 = vmatprep.subr.mxu0 %v1099_v40 }
 0x5b2   :  { %v798_v60 = vpop.xlane.xlu0 %797 }
 0x5b3   :  { %3657 = vrcp.f32 %v798_v60 }
 0x5b6   :  { %v795_v47 = vpop.xlane.xlu1 %794 }
 0x5b7   :  { %3659 = vrcp.f32 %v795_v47 }
 0x5ba   :  { %v804_v61 = vpop.xlane.xlu0 %803  ;;  %v801_v62 = vpop.xlane.xlu1 %800 }
 0x5bb   :  { %3661 = vrcp.f32 %v804_v61 }
 0x5bc   :  { %3663 = vrcp.f32 %v801_v62 }
 0x5be   :  { %v810_v63 = vpop.xlane.xlu0 %809  ;;  %v807_v0 = vpop.xlane.xlu1 %806 }
 0x5bf   :  { %3665 = vrcp.f32 %v810_v63 }
 0x5c0   :  { %3667 = vrcp.f32 %v807_v0  ;;  %v3658_v1 = vpop.eup %3657 }
 0x5c1   :  { %v818_v52 = vmul.f32 %v3658_v1, %v4110_v22 }
 0x5c2   :  { %v1010_v49 = vpop.permute.xlu1 %1009  ;;  %v1097_v7 = vpop.permute.xlu0 %1096 }
 0x5c3   :  { %3445 = vmatprep.subr.mxu1 %v1010_v49  ;;  %v830_v3 = vmul.f32 %v818_v52, %v4145_v59 }
 0x5c4   :  { %v3660_v54 = vpop.eup %3659  ;;  %3446 = vmatpush3.msra.mxu1 %v1010_v49 }
 0x5c5   :  { %v816_v57 = vmul.f32 %v3660_v54, %v4114_v25  ;;  %3457 = vmatprep.subr.mxu1 %v1217_v18 }
 0x5c7   :  { %v829_v51 = vmul.f32 %v816_v57, %v4142_v55  ;;  %v1355_v57 = vld [vmem:[%s4614_s17 + $0x10] sm:$0xff] }
 0x5c8   :  { %v3662_v2 = vpop.eup %3661 }
 0x5c9   :  { %v3664_v4 = vpop.eup %3663  ;;  %3440 = vmatprep.mubr.msk.f32.mxu0 %vm133_vm0, %v829_v51  ;;  %v822_v5 = vmul.f32 %v3662_v2, %v4120_v29  ;;  %v1354_v51 = vld [vmem:[%s4614_s17 + $0x8] sm:$0xff]  ;;  %v1353_v2 = vld [vmem:[%s4614_s17] sm:$0xff] }
 0x5ca   :  { %3441 = vmatmul.mubr.msk.f32.vlgmr.msra.gmra.mxu0 %vm133_vm0, %v830_v3  ;;  %v820_v6 = vmul.f32 %v3664_v4, %v4118_v28 }
 0x5cb   :  { %3451 = vmatpush3.msra.mxu0 %v1099_v40  ;;  %v832_v8 = vmul.f32 %v822_v5, %v4145_v59 }
 0x5cc   :  { %v3666_v10 = vpop.eup %3665  ;;  %3452 = vmatprep.subr.mxu0 %v1097_v7  ;;  %v831_v11 = vmul.f32 %v820_v6, %v4142_v55 }
 0x5cd   :  { %v3668_v12 = vpop.eup %3667  ;;  %3453 = vmatpush3.msra.mxu0 %v1097_v7  ;;  %v826_v14 = vmul.f32 %v3666_v10, %v4128_v34 }
 0x5ce   :  { %3447 = vmatprep.mubr.msk.f32.mxu1 %vm133_vm0, %v831_v11  ;;  %v824_v15 = vmul.f32 %v3668_v12, %v4126_v33  ;;  %v3166_v11 = vld [vmem:[%s4612_s15] ss:$0 sm:$0xff] }
 0x5cf   :  { %3448 = vmatmul.mubr.msk.f32.vlgmr.msra.gmra.mxu1 %vm133_vm0, %v832_v8  ;;  %v834_v16 = vmul.f32 %v826_v14, %v4145_v59  ;;  %v3167_v14 = vld [vmem:[%s4613_s16] ss:$0 sm:$0xff] }
 0x5d0   :  { %v833_v17 = vmul.f32 %v824_v15, %v4142_v55  ;;  %3458 = vmatpush3.msra.mxu1 %v1217_v18 }
 0x5d1   :  { %3459 = vmatprep.subr.mxu1 %v1216_v20 }
 0x5d2   :  { %3454 = vmatprep.mubr.msk.f32.mxu0 %vm133_vm0, %v833_v17  ;;  %3460 = vmatpush3.msra.mxu1 %v1216_v20 }
 0x5d3   :  { %3455 = vmatmul.mubr.msk.f32.vlgmr.msra.gmra.mxu0 %vm133_vm0, %v834_v16  ;;  %3461 = vmatprep.subr.mxu1 %v1215_v21 }
 0x5d4   :  { %3462 = vmatpush3.msra.mxu1 %v1215_v21  ;;  %v1506_v21 = vld [vmem:[%s4616_s19 + $0x38] sm:$0xff] }
 0x5d5   :  { %3463 = vmatprep.subr.mxu1 %v1214_v23 }
 0x5d6   :  { %3464 = vmatpush3.msra.mxu1 %v1214_v23  ;;  %v1504_v23 = vld [vmem:[%s4616_s19 + $0x28] sm:$0xff] }
 0x5d7   :  { %3479 = vmatprep.subr.mxu1 %v1506_v21 }
 0x638   :  { %v3435_v19 = vpop.f32.mrf.mxu0 }
 0x63a   :  { %v913_v22 = vpop.f32.mrf.mxu0 }
 0x68a   :  { %v3442_v24 = vpop.f32.mrf.mxu0 }
 0x68b   :  { %1187 = vrot.lane.b32.xlu0 %v3442_v24, %s3762_s20  ;;  %v1503_v24 = vld [vmem:[%s4616_s19 + $0x20] sm:$0xff] }
 0x68c   :  { %v1000_v25 = vpop.f32.mrf.mxu0 }
 0x68d   :  { %1185 = vrot.lane.b32.xlu1 %v1000_v25, %s3762_s20  ;;  %v1502_v25 = vld [vmem:[%s4616_s19 + $0x18] sm:$0xff] }
 0x68f   :  { %v3449_v26 = vpop.f32.mrf.mxu1 }
 0x690   :  { %1195 = vrot.lane.b32.xlu0 %v3449_v26, %s3763_s27  ;;  %v1501_v26 = vld [vmem:[%s4616_s19 + $0x10] sm:$0xff] }
 0x691   :  { %v1087_v27 = vpop.f32.mrf.mxu1 }
 0x692   :  { %1193 = vrot.lane.b32.xlu1 %v1087_v27, %s3763_s27  ;;  %v1500_v27 = vld [vmem:[%s4616_s19 + $0x8] sm:$0xff] }
 0x693   :  { %v3456_v28 = vpop.f32.mrf.mxu0 }
 0x694   :  { %1203 = vrot.lane.b32.xlu0 %v3456_v28, %s4630_s4  ;;  %v1499_v28 = vld [vmem:[%s4616_s19] sm:$0xff] }
 0x695   :  { %v1174_v29 = vpop.f32.mrf.mxu0 }
 0x696   :  { %1201 = vrot.lane.b32.xlu1 %v1174_v29, %s4630_s4  ;;  %v3168_v29 = vld [vmem:[%s4615_s18] ss:$0 sm:$0xff] }
 0x6fd   :  { %v1188_v30 = vpop.permute.xlu0 %1187 }
 0x6fe   :  { %v1208_v36 = vsel %vm386_vm2, %v3435_v19, %v1188_v30 }
 0x6ff   :  { %v1186_v31 = vpop.permute.xlu1 %1185 }
 0x700   :  { %v1207_v34 = vsel %vm386_vm2, %v913_v22, %v1186_v31  ;;  %v1505_v22 = vld [vmem:[%s4616_s19 + $0x30] sm:$0xff] }
 0x702   :  { %v1196_v32 = vpop.permute.xlu0 %1195 }
 0x703   :  { %v1210_v39 = vsel %vm133_vm0, %v1208_v36, %v1196_v32 }
 0x704   :  { %v1194_v33 = vpop.permute.xlu1 %1193 }
 0x705   :  { %v1209_v37 = vsel %vm133_vm0, %v1207_v34, %v1194_v33 }
 0x706   :  { %v1204_v35 = vpop.permute.xlu0 %1203 }
 0x707   :  { %v1213_v41 = vsel %vm1211_vm5, %v1210_v39, %v1204_v35 }
 0x708   :  { %v1202_v38 = vpop.permute.xlu1 %1201 }
 0x709   :  { %v1212_v40 = vsel %vm1211_vm5, %v1209_v37, %v1202_v38 }
 0x70a   :  { %3465 = vmatprep.mubr.msk.f32.mxu1 %vm278_vm1, %v1212_v40 }
 0x70b   :  { %3466 = vmatmul.mubr.msk.f32.vlgmr.msra.gmra.mxu1 %vm278_vm1, %v1213_v41 }
 0x70c   :  { %3480 = vmatpush3.msra.mxu1 %v1506_v21 }
 0x70d   :  { %3481 = vmatprep.subr.mxu1 %v1505_v22 }
 0x70e   :  { %3482 = vmatpush3.msra.mxu1 %v1505_v22 }
 0x70f   :  { %3483 = vmatprep.subr.mxu1 %v1504_v23 }
 0x710   :  { %3484 = vmatpush3.msra.mxu1 %v1504_v23 }
 0x711   :  { %3485 = vmatprep.subr.mxu1 %v1503_v24 }
 0x712   :  { %3486 = vmatpush3.msra.mxu1 %v1503_v24 }
 0x713   :  { %3487 = vmatprep.subr.mxu1 %v1502_v25 }
 0x714   :  { %3488 = vmatpush3.msra.mxu1 %v1502_v25 }
 0x715   :  { %3489 = vmatprep.subr.mxu1 %v1501_v26 }
 0x716   :  { %3490 = vmatpush3.msra.mxu1 %v1501_v26 }
 0x717   :  { %3491 = vmatprep.subr.mxu1 %v1500_v27 }
 0x718   :  { %3492 = vmatpush3.msra.mxu1 %v1500_v27  ;;  %v3171_v27 = vld [vmem:[%s4653_s0] ss:$0 sm:$0xff] }
 0x719   :  { %3493 = vmatprep.subr.mxu1 %v1499_v28 }
 0x71a   :  { %3494 = vmatpush3.msra.mxu1 %v1499_v28 }
 0x7cb   :  { %v3467_v45 = vpop.f32.mrf.mxu1 }
 0x7cc   :  { %v1303_v46 = vadd.f32 %v3467_v45, %v3163_v42 }
 0x7cd   :  { %v1297_v48 = vpop.f32.mrf.mxu1 }
 0x7ce   :  { %v1298_v50 = vadd.f32 %v3163_v42, %v1297_v48  ;;  %v1307_v53 = vadd.f32 %v1303_v46, %v3946_v44 }
 0x7d0   :  { %v1313_v56 = vsel %vm278_vm1, %v1307_v53, 0.0  ;;  %v1306_v58 = vadd.f32 %v1298_v50, %v3944_v43  ;;  %v1356_v43 = vld [vmem:[%s4614_s17 + $0x18] sm:$0xff] }
 0x7d1   :  { %1314 = vadd.xlane.f32.xlu0 %v1313_v56  ;;  %3468 = vmatprep.subr.mxu0 %v1356_v43 }
 0x7d2   :  { %v1310_v60 = vsel %vm278_vm1, %v1306_v58, 0.0  ;;  %3469 = vmatpush3.msra.mxu0 %v1356_v43 }
 0x7d3   :  { %1311 = vadd.xlane.f32.xlu1 %v1310_v60  ;;  %3470 = vmatprep.subr.mxu0 %v1355_v57 }
 0x7d4   :  { %3471 = vmatpush3.msra.mxu0 %v1355_v57 }
 0x7d5   :  { %3472 = vmatprep.subr.mxu0 %v1354_v51 }
 0x7d6   :  { %3473 = vmatpush3.msra.mxu0 %v1354_v51 }
 0x7d7   :  { %3474 = vmatprep.subr.mxu0 %v1353_v2 }
 0x7d8   :  { %3475 = vmatpush3.msra.mxu0 %v1353_v2 }
 0x85a   :  { %v1315_v47 = vpop.xlane.xlu0 %1314 }
 0x85b   :  { %v1318_v61 = vmul.f32 0.03125, %v1315_v47 }
 0x85c   :  { %v1312_v62 = vpop.xlane.xlu1 %1311 }
 0x85d   :  { %v1317_v63 = vmul.f32 0.03125, %v1312_v62  ;;  %v1320_v0 = vsub.f32 %v1307_v53, %v1318_v61 }
 0x85f   :  { %v1319_v1 = vsub.f32 %v1306_v58, %v1317_v63  ;;  %v1322_v52 = vmul.f32 %v1320_v0, %v1320_v0 }
 0x861   :  { %v1321_v49 = vmul.f32 %v1319_v1, %v1319_v1  ;;  %v1326_v44 = vsel %vm278_vm1, %v1322_v52, 0.0 }
 0x863   :  { %v1323_v54 = vsel %vm278_vm1, %v1321_v49, 0.0 }
 0x864   :  { %1324 = vadd.xlane.f32.xlu0 %v1323_v54 }
 0x868   :  { %1327 = vadd.xlane.f32.xlu0 %v1326_v44 }
 0x8ed   :  { %v1325_v3 = vpop.xlane.xlu0 %1324 }
 0x8ee   :  { %v1329_v4 = vmul.f32 0.03125, %v1325_v3 }
 0x8f0   :  { %v1331_v5 = vadd.f32 1e-05, %v1329_v4 }
 0x8f1   :  { %v1328_v6 = vpop.xlane.xlu0 %1327 }
 0x8f2   :  { %3669 = vrsqrt.f32 %v1331_v5  ;;  %v1330_v7 = vmul.f32 0.03125, %v1328_v6 }
 0x8f4   :  { %v1332_v8 = vadd.f32 1e-05, %v1330_v7 }
 0x8f6   :  { %3671 = vrsqrt.f32 %v1332_v8 }
 0x8ff   :  { %v3670_v10 = vpop.eup %3669 }
 0x900   :  { %v1335_v12 = vmul.f32 %v3670_v10, %v1319_v1 }
 0x902   :  { %v1343_v15 = vmul.f32 %v3166_v11, %v1335_v12 }
 0x903   :  { %v3672_v16 = vpop.eup %3671 }
 0x904   :  { %v1336_v17 = vmul.f32 %v3672_v16, %v1320_v0  ;;  %v4222_v18 = vadd.f32 %v3167_v14, %v1343_v15 }
 0x906   :  { %v1344_v19 = vmul.f32 %v3166_v11, %v1336_v17  ;;  %3476 = vmatprep.mubr.msk.f32.mxu0 %vm278_vm1, %v4222_v18  ;;  %v3765_v11 = vmov -1.0  }
 0x908   :  { %v4226_v20 = vadd.f32 %v3167_v14, %v1344_v19 }
 0x90a   :  { %3477 = vmatmul.mubr.msk.f32.vlgmr.msra.gmra.mxu0 %vm278_vm1, %v4226_v20 }
 0x9ca   :  { %v3478_v30 = vpop.f32.mrf.mxu0 }
 0x9cb   :  { %v1442_v31 = vadd.f32 %v3478_v30, %v3168_v29 }
 0x9cc   :  { %v1436_v32 = vpop.f32.mrf.mxu0 }
 0x9cd   :  { %v1448_v33 = vmul.f32 0.70710677, %v1442_v31  ;;  %v1437_v34 = vadd.f32 %v3168_v29, %v1436_v32  ;;  %v1446_v24 = vmul.f32 0.5, %v1442_v31 }
 0x9cf   :  { %v1454_v35 = vand.u32 2147483647, %v1448_v33  ;;  %v1447_v36 = vmul.f32 0.70710677, %v1437_v34  ;;  %vm1450_vm6 = vcmp.ge.f32.partialorder %v1448_v33, 0.0  ;;  %v1445_v22 = vmul.f32 0.5, %v1437_v34 }
 0x9d0   :  { %v1452_v12 = vsel %vm1450_vm6, 1.0, %v3765_v11 }
 0x9d1   :  { %v1456_v37 = vmul.f32 0.3275911, %v1454_v35  ;;  %v1453_v38 = vand.u32 2147483647, %v1447_v36  ;;  %v1482_v42 = vsub.f32 0.0, %v1454_v35  ;;  %vm1449_vm7 = vcmp.ge.f32.partialorder %v1447_v36, 0.0 }
 0x9d2   :  { %v1451_v17 = vsel %vm1449_vm7, 1.0, %v3765_v11 }
 0x9d3   :  { %v1458_v39 = vadd.f32 1.0, %v1456_v37  ;;  %v1455_v40 = vmul.f32 0.3275911, %v1453_v38  ;;  %v1481_v45 = vsub.f32 0.0, %v1453_v38  ;;  %v1484_v46 = vmul.f32 %v1482_v42, %v1454_v35 }
 0x9d5   :  { %3673 = vrcp.f32 %v1458_v39  ;;  %v1457_v41 = vadd.f32 1.0, %v1455_v40  ;;  %v1483_v50 = vmul.f32 %v1481_v45, %v1453_v38  ;;  %v1487_v56 = vmul.f32 1.442695, %v1484_v46 }
 0x9d7   :  { %3675 = vrcp.f32 %v1457_v41  ;;  %v1485_v61 = vmul.f32 1.442695, %v1483_v50  ;;  %v3177_v50 = vld [vmem:[%s4608_s11 + $0x28] sm:$0xff] }
 0x9d8   :  { %3677 = vpow2.f32 %v1487_v56 }
 0x9d9   :  { %3679 = vpow2.f32 %v1485_v61 }
 0x9e2   :  { %v3674_v48 = vpop.eup %3673 }
 0x9e3   :  { %v1464_v53 = vmul.f32 1.0614054, %v3674_v48 }
 0x9e4   :  { %v3676_v58 = vpop.eup %3675 }
 0x9e5   :  { %v1466_v60 = vadd.f32 -1.4531521, %v1464_v53  ;;  %v1463_v47 = vmul.f32 1.0614054, %v3676_v58  ;;  %v3678_v4 = vpop.eup %3677  ;;  %v3176_v53 = vld [vmem:[%s4608_s11 + $0x20] sm:$0xff] }
 0x9e6   :  { %v3680_v8 = vpop.eup %3679 }
 0x9e7   :  { %v1468_v62 = vmul.f32 %v3674_v48, %v1466_v60  ;;  %v1465_v63 = vadd.f32 -1.4531521, %v1463_v47 }
 0x9e9   :  { %v1470_v0 = vadd.f32 1.4214138, %v1468_v62  ;;  %v1467_v1 = vmul.f32 %v3676_v58, %v1465_v63 }
 0x9eb   :  { %v1472_v49 = vmul.f32 %v3674_v48, %v1470_v0  ;;  %v1469_v54 = vadd.f32 1.4214138, %v1467_v1  ;;  %v3174_v0 = vld [vmem:[%s4618_s21] ss:$0 sm:$0xff] }
 0x9ed   :  { %v1474_v52 = vadd.f32 -0.28449672, %v1472_v49  ;;  %v1471_v44 = vmul.f32 %v3676_v58, %v1469_v54 }
 0x9ef   :  { %v1476_v43 = vmul.f32 %v3674_v48, %v1474_v52  ;;  %v1473_v57 = vadd.f32 -0.28449672, %v1471_v44  ;;  %v3175_v44 = vld [vmem:[%s4619_s22] ss:$0 sm:$0xff] }
 0x9f1   :  { %v1478_v51 = vadd.f32 0.2548296, %v1476_v43  ;;  %v1475_v2 = vmul.f32 %v3676_v58, %v1473_v57 }
 0x9f3   :  { %v1480_v3 = vmul.f32 %v3674_v48, %v1478_v51  ;;  %v1477_v5 = vadd.f32 0.2548296, %v1475_v2  ;;  %v3178_v48 = vld [vmem:[%s4608_s11 + $0x30] sm:$0xff]  ;;  %v3181_v2 = vld [vmem:[%s4609_s12 + $0x1] ss:$0 sm:$0xff] }
 0x9f5   :  { %v1490_v6 = vmul.f32 %v3678_v4, %v1480_v3  ;;  %v1479_v7 = vmul.f32 %v3676_v58, %v1477_v5 }
 0x9f7   :  { %v1492_v10 = vsub.f32 1.0, %v1490_v6  ;;  %v1489_v14 = vmul.f32 %v3680_v8, %v1479_v7 }
 0x9f9   :  { %v1494_v15 = vmul.f32 %v1492_v10, %v1452_v12  ;;  %v1491_v16 = vsub.f32 1.0, %v1489_v14 }
 0x9fb   :  { %v1493_v19 = vmul.f32 %v1491_v16, %v1451_v17  ;;  %v1496_v21 = vadd.f32 1.0, %v1494_v15 }
 0x9fd   :  { %v1495_v23 = vadd.f32 1.0, %v1493_v19  ;;  %v1498_v26 = vmul.f32 %v1496_v21, %v1446_v24 }
 0x9ff   :  { %v1497_v25 = vmul.f32 %v1495_v23, %v1445_v22 }
 0xa01   :  { %3495 = vmatprep.mubr.msk.f32.mxu1 %vm1514_vm8, %v1497_v25 }
 0xa02   :  { %3496 = vmatmul.mubr.msk.f32.vlgmr.msra.gmra.mxu1 %vm1514_vm8, %v1498_v26  ;;  %v3185_v26 = vld [vmem:[%s4650_s9 + $0x48] sm:$0xff] }
 0xac2   :  { %v3497_v28 = vpop.f32.mrf.mxu1 }
 0xac3   :  { %v1593_v29 = vadd.f32 %v3497_v28, %v3171_v27  ;;  %v3184_v28 = vld [vmem:[%s4650_s9 + $0x40] sm:$0xff] }
 0xac4   :  { %v1587_v30 = vpop.f32.mrf.mxu1 }
 0xac5   :  { %v1588_v32 = vadd.f32 %v3171_v27, %v1587_v30  ;;  %v1597_v33 = vadd.f32 %v1593_v29, %v4226_v20 }
 0xac7   :  { %v1603_v34 = vsel %vm278_vm1, %v1597_v33, 0.0  ;;  %v1596_v31 = vadd.f32 %v1588_v32, %v4222_v18  ;;  %v3179_v18 = vld [vmem:[%s4608_s11 + $0x38] sm:$0xff] }
 0xac8   :  { %1604 = vadd.xlane.f32.xlu0 %v1603_v34  ;;  %3498 = vmatprep.subr.mxu0 %v3179_v18 }
 0xac9   :  { %v1600_v35 = vsel %vm278_vm1, %v1596_v31, 0.0  ;;  %3499 = vmatpush3.msra.mxu0 %v3179_v18  ;;  %v3191_v18 = vld [vmem:[%s4650_s9 + $0x78] sm:$0xff] }
 0xaca   :  { %1601 = vadd.xlane.f32.xlu1 %v1600_v35  ;;  %3500 = vmatprep.subr.mxu0 %v3178_v48 }
 0xacb   :  { %3501 = vmatpush3.msra.mxu0 %v3178_v48 }
 0xacc   :  { %3502 = vmatprep.subr.mxu0 %v3177_v50 }
 0xacd   :  { %3503 = vmatpush3.msra.mxu0 %v3177_v50 }
 0xace   :  { %3504 = vmatprep.subr.mxu0 %v3176_v53 }
 0xacf   :  { %3505 = vmatpush3.msra.mxu0 %v3176_v53  ;;  %v3190_v53 = vld [vmem:[%s4650_s9 + $0x70] sm:$0xff] }
 0xb51   :  { %v1605_v36 = vpop.xlane.xlu0 %1604 }
 0xb52   :  { %v1607_v37 = vmul.f32 0.03125, %v1605_v36  ;;  %v3187_v36 = vld [vmem:[%s4650_s9 + $0x58] sm:$0xff] }
 0xb53   :  { %v1602_v38 = vpop.xlane.xlu1 %1601 }
 0xb54   :  { %v1609_v39 = vsub.f32 %v1597_v33, %v1607_v37  ;;  %v1606_v40 = vmul.f32 0.03125, %v1602_v38  ;;  %v3186_v38 = vld [vmem:[%s4650_s9 + $0x50] sm:$0xff] }
 0xb56   :  { %v1608_v41 = vsub.f32 %v1596_v31, %v1606_v40  ;;  %v1611_v42 = vmul.f32 %v1609_v39, %v1609_v39 }
 0xb58   :  { %v1615_v45 = vsel %vm278_vm1, %v1611_v42, 0.0  ;;  %v1610_v46 = vmul.f32 %v1608_v41, %v1608_v41 }
 0xb59   :  { %1616 = vadd.xlane.f32.xlu0 %v1615_v45 }
 0xb5a   :  { %v1612_v20 = vsel %vm278_vm1, %v1610_v46, 0.0 }
 0xb5b   :  { %1613 = vadd.xlane.f32.xlu1 %v1612_v20  ;;  %v3189_v20 = vld [vmem:[%s4650_s9 + $0x68] sm:$0xff] }
 0xbe2   :  { %v1617_v56 = vpop.xlane.xlu0 %1616 }
 0xbe3   :  { %v1619_v58 = vmul.f32 0.03125, %v1617_v56  ;;  %v3188_v56 = vld [vmem:[%s4650_s9 + $0x60] sm:$0xff] }
 0xbe4   :  { %v1614_v60 = vpop.xlane.xlu1 %1613 }
 0xbe5   :  { %v1621_v47 = vadd.f32 1e-05, %v1619_v58  ;;  %v1618_v61 = vmul.f32 0.03125, %v1614_v60 }
 0xbe7   :  { %3681 = vrsqrt.f32 %v1621_v47  ;;  %v1620_v62 = vadd.f32 1e-05, %v1618_v61 }
 0xbe9   :  { %3683 = vrsqrt.f32 %v1620_v62 }
 0xbf4   :  { %v3682_v63 = vpop.eup %3681 }
 0xbf5   :  { %v1625_v1 = vmul.f32 %v3682_v63, %v1609_v39 }
 0xbf6   :  { %v3684_v49 = vpop.eup %3683 }
 0xbf7   :  { %v1624_v54 = vmul.f32 %v3684_v49, %v1608_v41  ;;  %v1633_v52 = vmul.f32 %v3174_v0, %v1625_v1 }
 0xbf9   :  { %v1632_v43 = vmul.f32 %v3174_v0, %v1624_v54  ;;  %v4290_v51 = vadd.f32 %v3175_v44, %v1633_v52 }
 0xbfb   :  { %v4288_v57 = vadd.f32 %v3175_v44, %v1632_v43 }
 0xbfd   :  { %3506 = vmatprep.mubr.msk.f32.mxu0 %vm278_vm1, %v4288_v57 }
 0xbfe   :  { %3507 = vmatmul.mubr.msk.f32.vlgmr.msra.gmra.mxu0 %vm278_vm1, %v4290_v51 }
 0xcbe   :  { %v3508_v3 = vpop.f32.mrf.mxu0 }
 0xcbf   :  { %v4299_v4 = vadd.f32 %v3508_v3, %v3181_v2 }
 0xcc0   :  { %v1727_v5 = vpop.f32.mrf.mxu0 }
 0xcc1   :  { %v4301_v6 = vadd.f32 %v3181_v2, %v1727_v5  ;;  %1740 = vrot.lane.b32.xlu1 %v4299_v4, %s3756_s29 }
 0xcc3   :  { %1738 = vrot.lane.b32.xlu0 %v4301_v6, %s3756_s29  ;;  %3513 = vmatprep.mubr.msk.f32.mxu0 %vm386_vm2, %v4301_v6 }
 0xcc5   :  { %1744 = vrot.lane.b32.xlu1 %v4299_v4, %s3755_s10 }
 0xcc7   :  { %1746 = vrot.lane.b32.xlu0 %v4301_v6, %s3759_s6 }
 0xcc9   :  { %1748 = vrot.lane.b32.xlu1 %v4299_v4, %s3759_s6 }
 0xccd   :  { %1742 = vrot.lane.b32.xlu1 %v4301_v6, %s3755_s10 }
 0xcd1   :  { %1761 = vrot.lane.b32.xlu1 %v4299_v4, %s3758_s2 }
 0xcd5   :  { %1759 = vrot.lane.b32.xlu1 %v4301_v6, %s3758_s2 }
 0xd33   :  { %v4321_v7 = vpop.permute.xlu1 %1740 }
 0xd34   :  { %1848 = vrot.lane.b32.xlu0 %v4321_v7, %s3758_s2 }
 0xd35   :  { %v4325_v8 = vpop.permute.xlu0 %1738 }
 0xd36   :  { %3520 = vmatprep.mubr.msk.f32.mxu1 %vm386_vm2, %v4325_v8 }
 0xd37   :  { %v4329_v10 = vpop.permute.xlu1 %1744 }
 0xd38   :  { %1935 = vrot.lane.b32.xlu1 %v4329_v10, %s3758_s2  ;;  %1846 = vrot.lane.b32.xlu0 %v4325_v8, %s3758_s2 }
 0xd39   :  { %v4339_v14 = vpop.permute.xlu0 %1746 }
 0xd3b   :  { %v4335_v12 = vpop.permute.xlu1 %1748 }
 0xd3c   :  { %2022 = vrot.lane.b32.xlu0 %v4335_v12, %s3758_s2 }
 0xd3f   :  { %v4341_v15 = vpop.permute.xlu1 %1742 }
 0xd40   :  { %1933 = vrot.lane.b32.xlu1 %v4341_v15, %s3758_s2  ;;  %2020 = vrot.lane.b32.xlu0 %v4339_v14, %s3758_s2 }
 0xd43   :  { %v1762_v16 = vpop.permute.xlu1 %1761 }
 0xd44   :  { %3509 = vmatprep.subr.msk.mxu0 %vm386_vm2, %v1762_v16 }
 0xd45   :  { %3510 = vmatpush3.xpose.msk.msra.mxu0 %vm386_vm2, %v1762_v16 }
 0xd47   :  { %v1760_v17 = vpop.permute.xlu1 %1759 }
 0xd48   :  { %3511 = vmatprep.subr.msk.mxu0 %vm386_vm2, %v1760_v17 }
 0xd49   :  { %3512 = vmatpush3.xpose.msk.msra.mxu0 %vm386_vm2, %v1760_v17 }
 0xd4c   :  { %3514 = vmatmul.mubr.msk.f32.vlgmr.msra.gmra.mxu0 %vm386_vm2, %v4299_v4 }
 0xd4d   :  { %3527 = vmatprep.mubr.msk.f32.mxu0 %vm386_vm2, %v4341_v15 }
 0xda6   :  { %v1849_v19 = vpop.permute.xlu0 %1848 }
 0xda7   :  { %3516 = vmatprep.subr.msk.mxu1 %vm386_vm2, %v1849_v19 }
 0xda8   :  { %3517 = vmatpush3.xpose.msk.msra.mxu1 %vm386_vm2, %v1849_v19 }
 0xdaa   :  { %v1936_v21 = vpop.permute.xlu1 %1935  ;;  %v1847_v22 = vpop.permute.xlu0 %1846 }
 0xdab   :  { %3518 = vmatprep.subr.msk.mxu1 %vm386_vm2, %v1847_v22  ;;  %3523 = vmatprep.subr.msk.mxu0 %vm386_vm2, %v1936_v21 }
 0xdac   :  { %3519 = vmatpush3.xpose.msk.msra.mxu1 %vm386_vm2, %v1847_v22  ;;  %3524 = vmatpush3.xpose.msk.msra.mxu0 %vm386_vm2, %v1936_v21 }
 0xdae   :  { %v2023_v23 = vpop.permute.xlu0 %2022 }
 0xdaf   :  { %3521 = vmatmul.mubr.msk.f32.vlgmr.msra.gmra.mxu1 %vm386_vm2, %v4321_v7  ;;  %3530 = vmatprep.subr.msk.mxu1 %vm386_vm2, %v2023_v23 }
 0xdb0   :  { %3531 = vmatpush3.xpose.msk.msra.mxu1 %vm386_vm2, %v2023_v23  ;;  %3534 = vmatprep.mubr.msk.f32.mxu1 %vm386_vm2, %v4339_v14 }
 0xdb2   :  { %v1934_v24 = vpop.permute.xlu1 %1933  ;;  %v2021_v25 = vpop.permute.xlu0 %2020 }
 0xdb3   :  { %3525 = vmatprep.subr.msk.mxu0 %vm386_vm2, %v1934_v24  ;;  %3532 = vmatprep.subr.msk.mxu1 %vm386_vm2, %v2021_v25 }
 0xdb4   :  { %3526 = vmatpush3.xpose.msk.msra.mxu0 %vm386_vm2, %v1934_v24  ;;  %3533 = vmatpush3.xpose.msk.msra.mxu1 %vm386_vm2, %v2021_v25 }
 0xdb7   :  { %3528 = vmatmul.mubr.msk.f32.vlgmr.msra.gmra.mxu0 %vm386_vm2, %v4329_v10  ;;  %3535 = vmatmul.mubr.msk.f32.vlgmr.msra.gmra.mxu1 %vm386_vm2, %v4335_v12 }
 0xe0c   :  { %v3515_v27 = vpop.f32.mrf.mxu0 }
 0xe0d   :  { %v1843_v29 = vadd.f32 %v3515_v27, %v3185_v26 }
 0xe0e   :  { %v1837_v30 = vpop.f32.mrf.mxu0 }
 0xe0f   :  { %v1838_v32 = vadd.f32 %v3184_v28, %v1837_v30  ;;  %v2108_v33 = vadd.f32 %v1843_v29, %v4043_v9 }
 0xe11   :  { %v2118_v34 = vsel %vm133_vm0, %v2108_v33, -inf  ;;  %v2107_v31 = vadd.f32 %v1838_v32, %v4048_v13 }
 0xe12   :  { %2119 = vmax.xlane.f32.xlu0 %v2118_v34 }
 0xe13   :  { %v2115_v35 = vsel %vm133_vm0, %v2107_v31, -inf }
 0xe14   :  { %2116 = vmax.xlane.f32.xlu1 %v2115_v35 }
 0xe6f   :  { %v3522_v37 = vpop.f32.mrf.mxu1 }
 0xe70   :  { %v1930_v39 = vadd.f32 %v3522_v37, %v3187_v36 }
 0xe71   :  { %v1924_v40 = vpop.f32.mrf.mxu1 }
 0xe72   :  { %v1925_v41 = vadd.f32 %v3186_v38, %v1924_v40  ;;  %v2110_v42 = vadd.f32 %v1930_v39, %v4043_v9 }
 0xe74   :  { %v2124_v45 = vsel %vm133_vm0, %v2110_v42, -inf  ;;  %v2109_v46 = vadd.f32 %v1925_v41, %v4048_v13 }
 0xe75   :  { %2125 = vmax.xlane.f32.xlu0 %v2124_v45 }
 0xe76   :  { %v2121_v47 = vsel %vm133_vm0, %v2109_v46, -inf }
 0xe77   :  { %v3529_v48 = vpop.f32.mrf.mxu0  ;;  %v3536_v50 = vpop.f32.mrf.mxu1 }
 0xe78   :  { %v2017_v58 = vadd.f32 %v3529_v48, %v3189_v20  ;;  %v2104_v60 = vadd.f32 %v3536_v50, %v3191_v18 }
 0xe79   :  { %v2098_v61 = vpop.f32.mrf.mxu1  ;;  %2122 = vmax.xlane.f32.xlu0 %v2121_v47  ;;  %v2011_v62 = vpop.f32.mrf.mxu0 }
 0xe7a   :  { %v2099_v63 = vadd.f32 %v3190_v53, %v2098_v61  ;;  %v2012_v0 = vadd.f32 %v3188_v56, %v2011_v62  ;;  %v2112_v1 = vadd.f32 %v2017_v58, %v4043_v9  ;;  %v2114_v52 = vadd.f32 %v2104_v60, %v4043_v9 }
 0xe7c   :  { %v2130_v49 = vsel %vm133_vm0, %v2112_v1, -inf  ;;  %v2111_v54 = vadd.f32 %v2012_v0, %v4048_v13  ;;  %v2113_v43 = vadd.f32 %v2099_v63, %v4048_v13  ;;  %v2136_v2 = vsel %vm133_vm0, %v2114_v52, -inf }
 0xe7d   :  { %2131 = vmax.xlane.f32.xlu0 %v2130_v49 }
 0xe7e   :  { %v2127_v44 = vsel %vm133_vm0, %v2111_v54, -inf  ;;  %v2133_v3 = vsel %vm133_vm0, %v2113_v43, -inf }
 0xe7f   :  { %2128 = vmax.xlane.f32.xlu1 %v2127_v44 }
 0xe81   :  { %2137 = vmax.xlane.f32.xlu0 %v2136_v2 }
 0xe83   :  { %2134 = vmax.xlane.f32.xlu1 %v2133_v3 }
 0xe94   :  { %2213 = vrot.lane.b32.xlu1 %v4299_v4, %s3761_s26 }
 0xe97   :  { %2211 = vrot.lane.b32.xlu0 %v4301_v6, %s3761_s26 }
 0xe98   :  { %2300 = vrot.lane.b32.xlu1 %v4321_v7, %s3761_s26 }
 0xe9b   :  { %2474 = vrot.lane.b32.xlu0 %v4335_v12, %s3761_s26  ;;  %v2120_v9 = vpop.xlane.xlu0 %2119 }
 0xe9c   :  { %2298 = vrot.lane.b32.xlu1 %v4325_v8, %s3761_s26  ;;  %v2140_v13 = vsub.f32 %v2108_v33, %v2120_v9 }
 0xe9d   :  { %v2117_v16 = vpop.xlane.xlu1 %2116 }
 0xe9e   :  { %v2149_v5 = vmul.f32 1.442695, %v2140_v13  ;;  %v2139_v4 = vsub.f32 %v2107_v31, %v2117_v16 }
 0xea0   :  { %2387 = vrot.lane.b32.xlu1 %v4329_v10, %s3761_s26  ;;  %3685 = vpow2.f32 %v2149_v5  ;;  %v2147_v17 = vmul.f32 1.442695, %v2139_v4 }
 0xea2   :  { %3687 = vpow2.f32 %v2147_v17 }
 0xead   :  { %v4427_v6 = vpop.eup %3685 }
 0xeae   :  { %v2166_v7 = vsel %vm133_vm0, %v4427_v6, 0.0 }
 0xeaf   :  { %v4431_v12 = vpop.eup %3687 }
 0xeb0   :  { %v2163_v8 = vsel %vm133_vm0, %v4431_v12, 0.0 }
 0xeba   :  { %2167 = vadd.xlane.f32.xlu0 %v2166_v7 }
 0xec4   :  { %2164 = vadd.xlane.f32.xlu1 %v2163_v8 }
 0xefe   :  { %v2126_v10 = vpop.xlane.xlu0 %2125 }
 0xeff   :  { %v2142_v19 = vsub.f32 %v2110_v42, %v2126_v10 }
 0xf01   :  { %v2153_v21 = vmul.f32 1.442695, %v2142_v19 }
 0xf02   :  { %v2123_v22 = vpop.xlane.xlu0 %2122 }
 0xf03   :  { %3689 = vpow2.f32 %v2153_v21  ;;  %v2141_v23 = vsub.f32 %v2109_v46, %v2123_v22 }
 0xf05   :  { %v2151_v24 = vmul.f32 1.442695, %v2141_v23 }
 0xf06   :  { %v2132_v25 = vpop.xlane.xlu0 %2131 }
 0xf07   :  { %3691 = vpow2.f32 %v2151_v24  ;;  %v2144_v26 = vsub.f32 %v2112_v1, %v2132_v25 }
 0xf08   :  { %v2129_v27 = vpop.xlane.xlu1 %2128 }
 0xf09   :  { %v2157_v28 = vmul.f32 1.442695, %v2144_v26  ;;  %v2143_v29 = vsub.f32 %v2111_v54, %v2129_v27 }
 0xf0a   :  { %v2138_v30 = vpop.xlane.xlu0 %2137 }
 0xf0b   :  { %3693 = vpow2.f32 %v2157_v28  ;;  %v2155_v32 = vmul.f32 1.442695, %v2143_v29  ;;  %v2146_v33 = vsub.f32 %v2114_v52, %v2138_v30 }
 0xf0c   :  { %v2135_v34 = vpop.xlane.xlu1 %2134 }
 0xf0d   :  { %3695 = vpow2.f32 %v2155_v32  ;;  %v2161_v31 = vmul.f32 1.442695, %v2146_v33  ;;  %v2145_v35 = vsub.f32 %v2113_v43, %v2135_v34  ;;  %v3219_v32 = vld [vmem:[%s4610_s13 + $0x38] sm:$0xff]  ;;  %v3218_v33 = vld [vmem:[%s4610_s13 + $0x30] sm:$0xff] }
 0xf0e   :  { %v2212_v40 = vpop.permute.xlu0 %2211 }
 0xf0f   :  { %3697 = vpow2.f32 %v2161_v31  ;;  %v2159_v36 = vmul.f32 1.442695, %v2145_v35  ;;  %v3216_v31 = vld [vmem:[%s4610_s13 + $0x20] sm:$0xff] }
 0xf10   :  { %v4435_v37 = vpop.eup %3689  ;;  %v2214_v38 = vpop.permute.xlu1 %2213 }
 0xf11   :  { %3699 = vpow2.f32 %v2159_v36  ;;  %3537 = vmatprep.subr.mxu0 %v2214_v38  ;;  %v2172_v39 = vsel %vm133_vm0, %v4435_v37, 0.0 }
 0xf12   :  { %2173 = vadd.xlane.f32.xlu0 %v2172_v39  ;;  %3538 = vmatpush3.msra.mxu0 %v2214_v38  ;;  %v2475_v61 = vpop.permute.xlu0 %2474 }
 0xf13   :  { %3539 = vmatprep.subr.mxu0 %v2212_v40 }
 0xf14   :  { %v3692_v41 = vpop.eup %3691  ;;  %3540 = vmatpush3.msra.mxu0 %v2212_v40  ;;  %v2301_v42 = vpop.permute.xlu1 %2300 }
 0xf15   :  { %3544 = vmatprep.subr.mxu0 %v2301_v42  ;;  %v2169_v45 = vsel %vm133_vm0, %v3692_v41, 0.0 }
 0xf16   :  { %2170 = vadd.xlane.f32.xlu1 %v2169_v45 }
 0xf18   :  { %v3694_v46 = vpop.eup %3693  ;;  %v2299_v20 = vpop.permute.xlu1 %2298 }
 0xf19   :  { %v2178_v18 = vsel %vm133_vm0, %v3694_v46, 0.0 }
 0xf1a   :  { %v3696_v48 = vpop.eup %3695  ;;  %2179 = vadd.xlane.f32.xlu0 %v2178_v18 }
 0xf1b   :  { %v2175_v50 = vsel %vm133_vm0, %v3696_v48, 0.0 }
 0xf1c   :  { %v4442_v53 = vpop.eup %3697  ;;  %2176 = vadd.xlane.f32.xlu1 %v2175_v50  ;;  %v2388_v56 = vpop.permute.xlu1 %2387 }
 0xf1d   :  { %3551 = vmatprep.subr.mxu1 %v2388_v56  ;;  %v2184_v58 = vsel %vm133_vm0, %v4442_v53, 0.0 }
 0xf1e   :  { %v3700_v60 = vpop.eup %3699  ;;  %2185 = vadd.xlane.f32.xlu0 %v2184_v58  ;;  %3552 = vmatpush3.msra.mxu1 %v2388_v56 }
 0xf1f   :  { %v2181_v47 = vsel %vm133_vm0, %v3700_v60, 0.0 }
 0xf20   :  { %2182 = vadd.xlane.f32.xlu1 %v2181_v47 }
 0xf31   :  { %2385 = vrot.lane.b32.xlu1 %v4341_v15, %s3761_s26 }
 0xf34   :  { %2472 = vrot.lane.b32.xlu0 %v4339_v14, %s3761_s26 }
 0xf43   :  { %v2168_v62 = vpop.xlane.xlu0 %2167 }
 0xf44   :  { %3701 = vrcp.f32 %v2168_v62 }
 0xf4d   :  { %v2165_v63 = vpop.xlane.xlu1 %2164 }
 0xf4e   :  { %3703 = vrcp.f32 %v2165_v63 }
 0xf51   :  { %v3702_v0 = vpop.eup %3701 }
 0xf52   :  { %v2190_v49 = vmul.f32 %v3702_v0, %v4427_v6 }
 0xf54   :  { %v2204_v44 = vmul.f32 %v2190_v49, %v4145_v59 }
 0xf5b   :  { %v3704_v1 = vpop.eup %3703 }
 0xf5c   :  { %v2188_v54 = vmul.f32 %v3704_v1, %v4431_v12 }
 0xf5e   :  { %v2203_v52 = vmul.f32 %v2188_v54, %v4142_v55 }
 0xf60   :  { %3541 = vmatprep.mubr.msk.f32.mxu0 %vm133_vm0, %v2203_v52 }
 0xf61   :  { %3542 = vmatmul.mubr.msk.f32.vlgmr.msra.gmra.mxu0 %vm133_vm0, %v2204_v44 }
 0xf62   :  { %3545 = vmatpush3.msra.mxu0 %v2301_v42 }
 0xf63   :  { %3546 = vmatprep.subr.mxu0 %v2299_v20 }
 0xf64   :  { %3547 = vmatpush3.msra.mxu0 %v2299_v20 }
 0xf65   :  { %3558 = vmatprep.subr.mxu0 %v2475_v61 }
 0xf9b   :  { %v2174_v14 = vpop.xlane.xlu0 %2173 }
 0xf9c   :  { %3705 = vrcp.f32 %v2174_v14 }
 0xf9f   :  { %v2171_v15 = vpop.xlane.xlu1 %2170 }
 0xfa0   :  { %3707 = vrcp.f32 %v2171_v15 }
 0xfa3   :  { %v2180_v43 = vpop.xlane.xlu0 %2179 }
 0xfa4   :  { %3709 = vrcp.f32 %v2180_v43 }
 0xfa5   :  { %v2177_v2 = vpop.xlane.xlu1 %2176 }
 0xfa6   :  { %3711 = vrcp.f32 %v2177_v2 }
 0xfa7   :  { %v2186_v3 = vpop.xlane.xlu0 %2185 }
 0xfa8   :  { %3713 = vrcp.f32 %v2186_v3 }
 0xfa9   :  { %v2183_v9 = vpop.xlane.xlu1 %2182  ;;  %v3706_v13 = vpop.eup %3705 }
 0xfaa   :  { %3715 = vrcp.f32 %v2183_v9  ;;  %v2194_v4 = vmul.f32 %v3706_v13, %v4435_v37 }
 0xfab   :  { %v2473_v19 = vpop.permute.xlu0 %2472 }
 0xfac   :  { %v2206_v12 = vmul.f32 %v2194_v4, %v4145_v59  ;;  %v3228_v4 = vld [vmem:[%s4614_s17 + $0x20] sm:$0xff] }
 0xfad   :  { %v3708_v5 = vpop.eup %3707  ;;  %v2386_v16 = vpop.permute.xlu1 %2385 }
 0xfae   :  { %3553 = vmatprep.subr.mxu1 %v2386_v16  ;;  %v2192_v17 = vmul.f32 %v3708_v5, %v3692_v41  ;;  %v3230_v5 = vld [vmem:[%s4614_s17 + $0x30] sm:$0xff] }
 0xfaf   :  { %3554 = vmatpush3.msra.mxu1 %v2386_v16  ;;  %v3229_v16 = vld [vmem:[%s4614_s17 + $0x28] sm:$0xff] }
 0xfb0   :  { %v2205_v6 = vmul.f32 %v2192_v17, %v4142_v55  ;;  %3565 = vmatprep.subr.mxu1 %v3219_v32 }
 0xfb1   :  { %v3710_v7 = vpop.eup %3709 }
 0xfb2   :  { %3548 = vmatprep.mubr.msk.f32.mxu0 %vm133_vm0, %v2205_v6  ;;  %v2198_v10 = vmul.f32 %v3710_v7, %v3694_v46 }
 0xfb3   :  { %v3712_v8 = vpop.eup %3711  ;;  %3549 = vmatmul.mubr.msk.f32.vlgmr.msra.gmra.mxu0 %vm133_vm0, %v2206_v12 }
 0xfb4   :  { %3559 = vmatpush3.msra.mxu0 %v2475_v61  ;;  %v2196_v21 = vmul.f32 %v3712_v8, %v3696_v48  ;;  %v2208_v25 = vmul.f32 %v2198_v10, %v4145_v59 }
 0xfb5   :  { %v3714_v22 = vpop.eup %3713  ;;  %3560 = vmatprep.subr.mxu0 %v2473_v19 }
 0xfb6   :  { %3561 = vmatpush3.msra.mxu0 %v2473_v19  ;;  %v2207_v23 = vmul.f32 %v2196_v21, %v4142_v55  ;;  %v2202_v26 = vmul.f32 %v3714_v22, %v4442_v53  ;;  %v3226_v21 = vld [vmem:[%s4612_s15 + $0x1] ss:$0 sm:$0xff] }
 0xfb7   :  { %v3716_v24 = vpop.eup %3715 }
 0xfb8   :  { %3555 = vmatprep.mubr.msk.f32.mxu1 %vm133_vm0, %v2207_v23  ;;  %v2200_v27 = vmul.f32 %v3716_v24, %v3700_v60  ;;  %v2210_v29 = vmul.f32 %v2202_v26, %v4145_v59  ;;  %v3221_v60 = vld [vmem:[%s4611_s14 + $0x1] ss:$0 sm:$0xff] }
 0xfb9   :  { %3556 = vmatmul.mubr.msk.f32.vlgmr.msra.gmra.mxu1 %vm133_vm0, %v2208_v25  ;;  %v3227_v23 = vld [vmem:[%s4613_s16 + $0x1] ss:$0 sm:$0xff] }
 0xfba   :  { %v2209_v28 = vmul.f32 %v2200_v27, %v4142_v55  ;;  %3566 = vmatpush3.msra.mxu1 %v3219_v32  ;;  %v3217_v55 = vld [vmem:[%s4610_s13 + $0x28] sm:$0xff]  ;;  %v3242_v32 = vld [vmem:[%s4616_s19 + $0x70] sm:$0xff] }
 0xfbb   :  { %3567 = vmatprep.subr.mxu1 %v3218_v33 }
 0xfbc   :  { %3562 = vmatprep.mubr.msk.f32.mxu0 %vm133_vm0, %v2209_v28  ;;  %3568 = vmatpush3.msra.mxu1 %v3218_v33  ;;  %v3241_v33 = vld [vmem:[%s4616_s19 + $0x68] sm:$0xff] }
 0xfbd   :  { %3563 = vmatmul.mubr.msk.f32.vlgmr.msra.gmra.mxu0 %vm133_vm0, %v2210_v29  ;;  %3569 = vmatprep.subr.mxu1 %v3217_v55 }
 0xfbe   :  { %3570 = vmatpush3.msra.mxu1 %v3217_v55  ;;  %v3239_v55 = vld [vmem:[%s4616_s19 + $0x58] sm:$0xff] }
 0xfbf   :  { %3571 = vmatprep.subr.mxu1 %v3216_v31 }
 0xfc0   :  { %3572 = vmatpush3.msra.mxu1 %v3216_v31  ;;  %v3237_v31 = vld [vmem:[%s4616_s19 + $0x48] sm:$0xff] }
0x1021   :  { %v3543_v30 = vpop.f32.mrf.mxu0 }
0x1023   :  { %v2289_v34 = vpop.f32.mrf.mxu0 }
0x1073   :  { %v3550_v59 = vpop.f32.mrf.mxu0 }
0x1074   :  { %2563 = vrot.lane.b32.xlu0 %v3550_v59, %s3762_s20  ;;  %v3238_v59 = vld [vmem:[%s4616_s19 + $0x50] sm:$0xff] }
0x1075   :  { %v2376_v35 = vpop.f32.mrf.mxu0 }
0x1076   :  { %2561 = vrot.lane.b32.xlu1 %v2376_v35, %s3762_s20  ;;  %v3236_v35 = vld [vmem:[%s4616_s19 + $0x40] sm:$0xff] }
0x1079   :  { %v3557_v36 = vpop.f32.mrf.mxu1 }
0x107a   :  { %2571 = vrot.lane.b32.xlu0 %v3557_v36, %s3763_s27  ;;  %v3233_v36 = vld [vmem:[%s4615_s18 + $0x1] ss:$0 sm:$0xff] }
0x107b   :  { %v2463_v37 = vpop.f32.mrf.mxu1 }
0x107c   :  { %2569 = vrot.lane.b32.xlu1 %v2463_v37, %s3763_s27 }
0x107d   :  { %v3564_v38 = vpop.f32.mrf.mxu0 }
0x107e   :  { %2579 = vrot.lane.b32.xlu0 %v3564_v38, %s4654_s30 }
0x107f   :  { %v2550_v39 = vpop.f32.mrf.mxu0 }
0x1080   :  { %2577 = vrot.lane.b32.xlu1 %v2550_v39, %s4654_s30 }
0x10e6   :  { %v2564_v40 = vpop.permute.xlu0 %2563 }
0x10e7   :  { %v2584_v18 = vsel %vm386_vm2, %v3543_v30, %v2564_v40  ;;  %v3243_v30 = vld [vmem:[%s4616_s19 + $0x78] sm:$0xff] }
0x10e8   :  { %v2562_v41 = vpop.permute.xlu1 %2561  ;;  %3587 = vmatprep.subr.mxu1 %v3243_v30 }
0x10e9   :  { %v2583_v46 = vsel %vm386_vm2, %v2289_v34, %v2562_v41  ;;  %v3240_v34 = vld [vmem:[%s4616_s19 + $0x60] sm:$0xff] }
0x10ec   :  { %v2572_v42 = vpop.permute.xlu0 %2571 }
0x10ed   :  { %v2586_v53 = vsel %vm133_vm0, %v2584_v18, %v2572_v42 }
0x10ee   :  { %v2570_v45 = vpop.permute.xlu1 %2569 }
0x10ef   :  { %v2585_v48 = vsel %vm133_vm0, %v2583_v46, %v2570_v45 }
0x10f0   :  { %v2580_v20 = vpop.permute.xlu0 %2579 }
0x10f1   :  { %v2588_v58 = vsel %vm1211_vm5, %v2586_v53, %v2580_v20 }
0x10f2   :  { %v2578_v50 = vpop.permute.xlu1 %2577 }
0x10f3   :  { %v2587_v56 = vsel %vm1211_vm5, %v2585_v48, %v2578_v50 }
0x10f4   :  { %3573 = vmatprep.mubr.msk.f32.mxu1 %vm278_vm1, %v2587_v56 }
0x10f5   :  { %3574 = vmatmul.mubr.msk.f32.vlgmr.msra.gmra.mxu1 %vm278_vm1, %v2588_v58 }
0x10f6   :  { %3588 = vmatpush3.msra.mxu1 %v3243_v30 }
0x10f7   :  { %3589 = vmatprep.subr.mxu1 %v3242_v32 }
0x10f8   :  { %3590 = vmatpush3.msra.mxu1 %v3242_v32 }
0x10f9   :  { %3591 = vmatprep.subr.mxu1 %v3241_v33 }
0x10fa   :  { %3592 = vmatpush3.msra.mxu1 %v3241_v33  ;;  %v3245_v33 = vld [vmem:[%s4653_s0 + $0x1] ss:$0 sm:$0xff] }
0x10fb   :  { %3593 = vmatprep.subr.mxu1 %v3240_v34 }
0x10fc   :  { %3594 = vmatpush3.msra.mxu1 %v3240_v34 }
0x10fd   :  { %3595 = vmatprep.subr.mxu1 %v3239_v55 }
0x10fe   :  { %3596 = vmatpush3.msra.mxu1 %v3239_v55 }
0x10ff   :  { %3597 = vmatprep.subr.mxu1 %v3238_v59 }
0x1100   :  { %3598 = vmatpush3.msra.mxu1 %v3238_v59 }
0x1101   :  { %3599 = vmatprep.subr.mxu1 %v3237_v31 }
0x1102   :  { %3600 = vmatpush3.msra.mxu1 %v3237_v31 }
0x1103   :  { %3601 = vmatprep.subr.mxu1 %v3236_v35 }
0x1104   :  { %3602 = vmatpush3.msra.mxu1 %v3236_v35 }
0x11b5   :  { %v3575_v47 = vpop.f32.mrf.mxu1 }
0x11b6   :  { %v2680_v61 = vadd.f32 %v3575_v47, %v3221_v60 }
0x11b7   :  { %v2674_v62 = vpop.f32.mrf.mxu1 }
0x11b8   :  { %v2684_v63 = vadd.f32 %v2680_v61, %v4290_v51  ;;  %v2675_v0 = vadd.f32 %v3221_v60, %v2674_v62 }
0x11ba   :  { %v2683_v1 = vadd.f32 %v2675_v0, %v4288_v57  ;;  %v2692_v49 = vsel %vm278_vm1, %v2684_v63, 0.0  ;;  %v3231_v57 = vld [vmem:[%s4614_s17 + $0x38] sm:$0xff] }
0x11bb   :  { %2693 = vadd.xlane.f32.xlu0 %v2692_v49  ;;  %3576 = vmatprep.subr.mxu0 %v3231_v57 }
0x11bc   :  { %v2689_v54 = vsel %vm278_vm1, %v2683_v1, 0.0  ;;  %3577 = vmatpush3.msra.mxu0 %v3231_v57 }
0x11bd   :  { %2690 = vadd.xlane.f32.xlu1 %v2689_v54  ;;  %3578 = vmatprep.subr.mxu0 %v3230_v5 }
0x11be   :  { %3579 = vmatpush3.msra.mxu0 %v3230_v5 }
0x11bf   :  { %3580 = vmatprep.subr.mxu0 %v3229_v16 }
0x11c0   :  { %3581 = vmatpush3.msra.mxu0 %v3229_v16 }
0x11c1   :  { %3582 = vmatprep.subr.mxu0 %v3228_v4 }
0x11c2   :  { %3583 = vmatpush3.msra.mxu0 %v3228_v4 }
0x1244   :  { %v2694_v52 = vpop.xlane.xlu0 %2693 }
0x1245   :  { %v2696_v44 = vmul.f32 0.03125, %v2694_v52 }
0x1246   :  { %v2691_v14 = vpop.xlane.xlu1 %2690 }
0x1247   :  { %v2695_v15 = vmul.f32 0.03125, %v2691_v14  ;;  %v2698_v43 = vsub.f32 %v2684_v63, %v2696_v44 }
0x1249   :  { %v2697_v2 = vsub.f32 %v2683_v1, %v2695_v15  ;;  %v2700_v13 = vmul.f32 %v2698_v43, %v2698_v43 }
0x124b   :  { %v2699_v3 = vmul.f32 %v2697_v2, %v2697_v2  ;;  %v2704_v51 = vsel %vm278_vm1, %v2700_v13, 0.0 }
0x124d   :  { %v2701_v9 = vsel %vm278_vm1, %v2699_v3, 0.0 }
0x124e   :  { %2702 = vadd.xlane.f32.xlu0 %v2701_v9 }
0x1252   :  { %2705 = vadd.xlane.f32.xlu0 %v2704_v51 }
0x12d7   :  { %v2703_v17 = vpop.xlane.xlu0 %2702 }
0x12d8   :  { %v2707_v6 = vmul.f32 0.03125, %v2703_v17 }
0x12da   :  { %v2709_v7 = vadd.f32 1e-05, %v2707_v6 }
0x12db   :  { %v2706_v12 = vpop.xlane.xlu0 %2705 }
0x12dc   :  { %3717 = vrsqrt.f32 %v2709_v7  ;;  %v2708_v8 = vmul.f32 0.03125, %v2706_v12 }
0x12de   :  { %v2710_v10 = vadd.f32 1e-05, %v2708_v8 }
0x12e0   :  { %3719 = vrsqrt.f32 %v2710_v10 }
0x12e9   :  { %v3718_v19 = vpop.eup %3717 }
0x12ea   :  { %v2713_v22 = vmul.f32 %v3718_v19, %v2697_v2 }
0x12ec   :  { %v2721_v24 = vmul.f32 %v3226_v21, %v2713_v22 }
0x12ed   :  { %v3720_v25 = vpop.eup %3719 }
0x12ee   :  { %v2714_v26 = vmul.f32 %v3720_v25, %v2698_v43  ;;  %v4524_v27 = vadd.f32 %v3227_v23, %v2721_v24 }
0x12f0   :  { %v2722_v28 = vmul.f32 %v3226_v21, %v2714_v26  ;;  %3584 = vmatprep.mubr.msk.f32.mxu0 %vm278_vm1, %v4524_v27 }
0x12f2   :  { %v4528_v29 = vadd.f32 %v3227_v23, %v2722_v28 }
0x12f4   :  { %3585 = vmatmul.mubr.msk.f32.vlgmr.msra.gmra.mxu0 %vm278_vm1, %v4528_v29 }
0x13b4   :  { %v3586_v37 = vpop.f32.mrf.mxu0 }
0x13b5   :  { %v2822_v38 = vadd.f32 %v3586_v37, %v3233_v36 }
0x13b6   :  { %v2816_v39 = vpop.f32.mrf.mxu0 }
0x13b7   :  { %v2828_v40 = vmul.f32 0.70710677, %v2822_v38  ;;  %v2817_v41 = vadd.f32 %v3233_v36, %v2816_v39  ;;  %v2826_v28 = vmul.f32 0.5, %v2822_v38 }
0x13b9   :  { %v2834_v42 = vand.u32 2147483647, %v2828_v40  ;;  %v2827_v45 = vmul.f32 0.70710677, %v2817_v41  ;;  %vm2830_vm9 = vcmp.ge.f32.partialorder %v2828_v40, 0.0  ;;  %v2825_v25 = vmul.f32 0.5, %v2817_v41 }
0x13ba   :  { %v2832_v8 = vsel %vm2830_vm9, 1.0, %v3765_v11 }
0x13bb   :  { %v2836_v46 = vmul.f32 0.3275911, %v2834_v42  ;;  %v2833_v20 = vand.u32 2147483647, %v2827_v45  ;;  %v2862_v53 = vsub.f32 0.0, %v2834_v42  ;;  %vm2829_vm10 = vcmp.ge.f32.partialorder %v2827_v45, 0.0 }
0x13bc   :  { %v2831_v22 = vsel %vm2829_vm10, 1.0, %v3765_v11 }
0x13bd   :  { %v2838_v18 = vadd.f32 1.0, %v2836_v46  ;;  %v2835_v48 = vmul.f32 0.3275911, %v2833_v20  ;;  %v2861_v56 = vsub.f32 0.0, %v2833_v20  ;;  %v2864_v58 = vmul.f32 %v2862_v53, %v2834_v42  ;;  %v3026_v53 = vld [vmem:[%s4620_s23 + $0x8] sm:$0xff] }
0x13bf   :  { %3721 = vrcp.f32 %v2838_v18  ;;  %v2837_v50 = vadd.f32 1.0, %v2835_v48  ;;  %v2863_v47 = vmul.f32 %v2861_v56, %v2833_v20  ;;  %v2867_v62 = vmul.f32 1.442695, %v2864_v58  ;;  %v3025_v56 = vld [vmem:[%s4620_s23] sm:$0xff] }
0x13c0   :  { %v3766_v48 = vmov 0.0  }
0x13c1   :  { %3723 = vrcp.f32 %v2837_v50  ;;  %v2865_v49 = vmul.f32 1.442695, %v2863_v47  ;;  %3606 = vmatprep.subr.mxu0 %v3766_v48  ;;  %v3027_v50 = vld [vmem:[%s4620_s23 + $0x10] sm:$0xff]  ;;  %3614 = vmatprep.mubr.msk.f32.mxu0 %vm3767_vm11, %v3766_v48 }
0x13c2   :  { %3725 = vpow2.f32 %v2867_v62 }
0x13c3   :  { %3727 = vpow2.f32 %v2865_v49 }
0x13cc   :  { %v3722_v60 = vpop.eup %3721 }
0x13cd   :  { %v2844_v61 = vmul.f32 1.0614054, %v3722_v60 }
0x13ce   :  { %v3724_v63 = vpop.eup %3723 }
0x13cf   :  { %v2846_v0 = vadd.f32 -1.4531521, %v2844_v61  ;;  %v2843_v1 = vmul.f32 1.0614054, %v3724_v63  ;;  %v3726_v16 = vpop.eup %3725 }
0x13d0   :  { %v3728_v7 = vpop.eup %3727 }
0x13d1   :  { %v2848_v54 = vmul.f32 %v3722_v60, %v2846_v0  ;;  %v2845_v52 = vadd.f32 -1.4531521, %v2843_v1  ;;  %v3250_v1 = vld [vmem:[%s4618_s21 + $0x1] ss:$0 sm:$0xff]  ;;  %s3768_s21 = smov [#allocation2]  }
0x13d2   :  { %s3121_s5 = sshll.u32 %s3768_s21, 4  ;;  %s3122_s5 = int_to_ptr.vmem [resolvable:$true] %s3121_s5 }
0x13d3   :  { %v2850_v44 = vadd.f32 1.4214138, %v2848_v54  ;;  %v2847_v14 = vmul.f32 %v3724_v63, %v2845_v52  ;;  %v3251_v52 = vld [vmem:[%s4619_s22 + $0x1] ss:$0 sm:$0xff]  ;;  %s3733_s22 = scalar_lea.vmem %s3122_s5, 32  ;;  %p3738_p1 = scmp.lt.s32.totalorder %s3122_s5, %s3122_s5 }
0x13d4   :  { %p3734_p0 = scmp.ne.s32.totalorder %s3122_s5, %s3733_s22  ;;  %p3739_p2 = scmp.lt.s32.totalorder %s3733_s22, %s3733_s22 }
0x13d5   :  { %v2852_v15 = vmul.f32 %v3722_v60, %v2850_v44  ;;  %v2849_v43 = vadd.f32 1.4214138, %v2847_v14 }
0x13d6   :  { %p3740_p3 = por %p3739_p2, %p3738_p1 }
0x13d7   :  { %v2854_v2 = vadd.f32 -0.28449672, %v2852_v15  ;;  %v2851_v3 = vmul.f32 %v3724_v63, %v2849_v43 }
0x13d8   :  { %p3741_p4 = pnand %p3740_p3, %p3734_p0 }
0x13d9   :  { %v2856_v9 = vmul.f32 %v3722_v60, %v2854_v2  ;;  %v2853_v13 = vadd.f32 -0.28449672, %v2851_v3 }
0x13db   :  { %v2858_v51 = vadd.f32 0.2548296, %v2856_v9  ;;  %v2855_v57 = vmul.f32 %v3724_v63, %v2853_v13  ;;  %v3252_v13 = vld [vmem:[%s4621_s24] ss:$0 sm:$0xff] }
0x13dd   :  { %v2860_v5 = vmul.f32 %v3722_v60, %v2858_v51  ;;  %v2857_v4 = vadd.f32 0.2548296, %v2855_v57 }
0x13df   :  { %v2870_v17 = vmul.f32 %v3726_v16, %v2860_v5  ;;  %v2859_v6 = vmul.f32 %v3724_v63, %v2857_v4 }
0x13e1   :  { %v2872_v12 = vsub.f32 1.0, %v2870_v17  ;;  %v2869_v10 = vmul.f32 %v3728_v7, %v2859_v6 }
0x13e3   :  { %v2874_v19 = vmul.f32 %v2872_v12, %v2832_v8  ;;  %v2871_v21 = vsub.f32 1.0, %v2869_v10 }
0x13e5   :  { %v2873_v23 = vmul.f32 %v2871_v21, %v2831_v22  ;;  %v2876_v24 = vadd.f32 1.0, %v2874_v19 }
0x13e7   :  { %v2875_v26 = vadd.f32 1.0, %v2873_v23  ;;  %v2878_v32 = vmul.f32 %v2876_v24, %v2826_v28 }
0x13e9   :  { %v2877_v30 = vmul.f32 %v2875_v26, %v2825_v25 }
0x13eb   :  { %3603 = vmatprep.mubr.msk.f32.mxu1 %vm1514_vm8, %v2877_v30 }
0x13ec   :  { %3604 = vmatmul.mubr.msk.f32.vlgmr.msra.gmra.mxu1 %vm1514_vm8, %v2878_v32 }
0x14ac   :  { %v3605_v34 = vpop.f32.mrf.mxu1 }
0x14ad   :  { %v2974_v55 = vadd.f32 %v3605_v34, %v3245_v33 }
0x14ae   :  { %v2968_v59 = vpop.f32.mrf.mxu1 }
0x14af   :  { %v2978_v11 = vadd.f32 %v2974_v55, %v4528_v29  ;;  %v2969_v31 = vadd.f32 %v3245_v33, %v2968_v59 }
0x14b1   :  { %v2977_v35 = vadd.f32 %v2969_v31, %v4524_v27  ;;  %v2986_v36 = vsel %vm278_vm1, %v2978_v11, 0.0  ;;  %v3028_v27 = vld [vmem:[%s4620_s23 + $0x18] sm:$0xff] }
0x14b2   :  { %2987 = vadd.xlane.f32.xlu1 %v2986_v36  ;;  %3607 = vmatpush3.msra.mxu0 %v3028_v27 }
0x14b3   :  { %v2983_v37 = vsel %vm278_vm1, %v2977_v35, 0.0  ;;  %3608 = vmatprep.subr.mxu0 %v3766_v48 }
0x14b4   :  { %2984 = vadd.xlane.f32.xlu0 %v2983_v37  ;;  %3609 = vmatpush3.msra.mxu0 %v3027_v50 }
0x14b5   :  { %3610 = vmatprep.subr.mxu0 %v3766_v48 }
0x14b6   :  { %3611 = vmatpush3.msra.mxu0 %v3026_v53 }
0x14b7   :  { %3612 = vmatprep.subr.mxu0 %v3766_v48 }
0x14b8   :  { %3613 = vmatpush3.msra.mxu0 %v3025_v56 }
0x153b   :  { %v2988_v38 = vpop.xlane.xlu1 %2987 }
0x153c   :  { %v2990_v39 = vmul.f32 0.03125, %v2988_v38 }
0x153d   :  { %v2985_v40 = vpop.xlane.xlu0 %2984 }
0x153e   :  { %v2992_v41 = vsub.f32 %v2978_v11, %v2990_v39  ;;  %v2989_v42 = vmul.f32 0.03125, %v2985_v40 }
0x1540   :  { %v2991_v45 = vsub.f32 %v2977_v35, %v2989_v42  ;;  %v2994_v46 = vmul.f32 %v2992_v41, %v2992_v41 }
0x1542   :  { %v2998_v20 = vsel %vm278_vm1, %v2994_v46, 0.0  ;;  %v2993_v18 = vmul.f32 %v2991_v45, %v2991_v45 }
0x1543   :  { %2999 = vadd.xlane.f32.xlu1 %v2998_v20 }
0x1544   :  { %v2995_v29 = vsel %vm278_vm1, %v2993_v18, 0.0 }
0x1545   :  { %2996 = vadd.xlane.f32.xlu0 %v2995_v29 }
0x15cc   :  { %v3000_v58 = vpop.xlane.xlu1 %2999 }
0x15cd   :  { %v3002_v60 = vmul.f32 0.03125, %v3000_v58 }
0x15ce   :  { %v2997_v47 = vpop.xlane.xlu0 %2996 }
0x15cf   :  { %v3004_v61 = vadd.f32 1e-05, %v3002_v60  ;;  %v3001_v62 = vmul.f32 0.03125, %v2997_v47 }
0x15d1   :  { %3729 = vrsqrt.f32 %v3004_v61  ;;  %v3003_v63 = vadd.f32 1e-05, %v3001_v62 }
0x15d3   :  { %3731 = vrsqrt.f32 %v3003_v63 }
0x15de   :  { %v3730_v0 = vpop.eup %3729 }
0x15df   :  { %v3008_v49 = vmul.f32 %v3730_v0, %v2992_v41 }
0x15e0   :  { %v3732_v54 = vpop.eup %3731 }
0x15e1   :  { %v3007_v44 = vmul.f32 %v3732_v54, %v2991_v45  ;;  %v3016_v14 = vmul.f32 %v3250_v1, %v3008_v49 }
0x15e3   :  { %v3015_v15 = vmul.f32 %v3250_v1, %v3007_v44  ;;  %v3024_v43 = vadd.f32 %v3251_v52, %v3016_v14 }
0x15e5   :  { %v3023_v2 = vadd.f32 %v3251_v52, %v3015_v15  ;;  %v3038_v3 = vrot.slane %v3024_v43, 7 }
0x15e7   :  { %v3040_v9 = vsel %vm3039_vm12, %v3038_v3, %v3023_v2 }
0x15e8   :  { %3615 = vmatmul.mubr.msk.f32.vlgmr.msra.gmra.mxu0 %vm278_vm1, %v3040_v9 }
0x16a8   :  { %v3109_v51 = vpop.f32.mrf.mxu0 }
0x16a9   :  { %v3110_v57 = vadd.f32 %v3252_v13, %v3109_v51 }
0x16aa   :  { %v3616_v5 = vpop.f32.mrf.mxu0 }
0x16ab   :  { %3114 = vst.msk [vmem:[#allocation2] sm:$0x3] %vm3113_vm13, %v3110_v57 }
0x16ac   :  { %3744 = shalt.err (!%p3741_p4)
}
0x16ad   :  { %3124 = dma.vmem_to_hbm [thread:$0]  %s3122_s5, 32, %s4622_s25, [#allocation3]  }
0x16ae   :  { %3753 = dma.done.wait [#allocation3], 32  }
0x16af   :  { %3754 = vsyncadd [#allocation3], 4294967264 }
0x16b0   :  { %3128 = vsyncpa [#allocation3], 1 }

</bundles_post_ra>
